<compile_context>
chip_gen: v5e
topology: v5e:2x2
jax: 0.10.0
libtpu: 0.0.40
codegen_flags: <defaults>
</compile_context>

<pallas_src>
import functools
import math

import jax
import jax.numpy as jnp
from jax.experimental import pallas as pl
from jax.experimental.pallas import tpu as pltpu


def qkv_attention_kernel(q_ref, k_ref, v_ref, o_ref, *, scale2):
    """One grid step: `bblk` batch rows, one head, one query-time tile.

    q_ref: [bblk, ch, tq]   k_ref / v_ref: [bblk, ch, T]   o_ref: [bblk, ch, tq]
    """
    # scale = 1/sqrt(sqrt(ch)) applied to both q and k  ==  scale^2 on q only.
    qs = (q_ref[...].astype(jnp.float32) * scale2).astype(jnp.bfloat16)
    kb = k_ref[...].astype(jnp.bfloat16)
    vb = v_ref[...].astype(jnp.bfloat16)

    # s[b, t, s'] = sum_c q[b, c, t] * k[b, c, s']   (f32 MXU accumulation)
    s = jnp.einsum('bct,bcs->bts', qs, kb,
                   preferred_element_type=jnp.float32)           # [bblk, tq, T]

    # softmax_one: exp(x - max) / (1 + sum(exp(x - max))), math in f32.
    # Normalization is deferred past the PV matmul (divide [ch, tq] not [tq, T]).
    s = s - jnp.max(s, axis=-1, keepdims=True)
    e = jnp.exp(s)
    denom = 1.0 + jnp.sum(e, axis=-1)                            # [bblk, tq]

    # a[b, c, t] = sum_s e[b, t, s] * v[b, c, s]
    a = jnp.einsum('bts,bcs->bct', e.astype(jnp.bfloat16), vb,
                   preferred_element_type=jnp.float32)           # [bblk, ch, tq]
    inv = pl.reciprocal(denom, approx=True)                      # EUP slot
    o_ref[...] = (a * inv[:, None, :]).astype(o_ref.dtype)


def _vmem_budget():
    """Returns (block-selection budget, vmem_limit_bytes, has_two_tensorcores)."""
    phys = 128 * 1024 * 1024
    try:
        phys = int(getattr(pltpu.get_tpu_info(), "vmem_capacity_bytes", phys))
    except Exception:
        pass
    if phys <= 64 * 1024 * 1024:
        # v7x-class: 64 MiB VMEM per TensorCore, 2 TensorCores per chip.
        return 36 * 1024 * 1024, 52 * 1024 * 1024, True
    # v5e / v6e: 128 MiB physical VMEM, single TensorCore.
    return 64 * 1024 * 1024, 100 * 1024 * 1024, False


def _step_vmem_bytes(bblk, tq, ch, T, itemsize):
    """Conservative per-grid-step VMEM footprint estimate."""
    io = 2 * bblk * ch * (tq + T + T + tq) * itemsize   # q,k,v,out blocks, 2x buffered
    casts = bblk * ch * (tq + 2 * T) * 2                # bf16 copies of q, k, v
    scores = bblk * tq * T * (4 + 4 + 2)                # s (f32), e (f32), e (bf16)
    acc = bblk * ch * tq * 4 + 2 * bblk * tq * 4        # f32 PV result + denom/inv
    return io + casts + scores + acc


def _choose_blocks(B, n_heads, ch, T, itemsize):
    budget, vmem_limit, two_cores = _vmem_budget()

    # Tile the query/time axis only when a single batch row would not fit.
    tq = T
    while _step_vmem_bytes(1, tq, ch, T, itemsize) > budget and tq % 256 == 0:
        tq //= 2            # stays a multiple of 128 and a divisor of T
    # TODO(synk): for extreme T also tile the KV axis ("arbitrary" grid axis)
    # with online-softmax accumulators in VMEM scratch.

    # Largest batch block fitting the budget (no arbitrary cap).
    bblk = 1
    for b in range(min(B, 256), 0, -1):
        if _step_vmem_bytes(b, tq, ch, T, itemsize) <= budget:
            bblk = b
            break

    # Keep >= 2 grid steps only where megacore sharding exists (v7x-class).
    if two_cores and B >= 2 and bblk >= B and n_heads == 1 and tq == T:
        bblk = (B + 1) // 2

    return bblk, tq, vmem_limit


def qkv_attention_legacy(qkv, n_heads):
    """qkv: [B, n_heads*3*ch, T]  ->  [B, n_heads*ch, T]."""
    B, W, T = qkv.shape
    assert W % (3 * n_heads) == 0
    ch = W // (3 * n_heads)
    C = n_heads * ch
    # Per-head channel slabs sit on the sublane axis of every block.
    assert ch % 8 == 0, "per-head channel count must be a multiple of 8"
    # NOTE: T is the lane axis; T % 128 == 0 avoids masked partial stores.

    bblk, tq, vmem_limit = _choose_blocks(B, n_heads, ch, T, qkv.dtype.itemsize)

    # Non-divisor batch sizes: zero-pad and slice the result afterwards.
    Bp = pl.cdiv(B, bblk) * bblk
    if Bp != B:
        qkv = jnp.pad(qkv, ((0, Bp - B), (0, 0), (0, 0)))

    grid = (Bp // bblk, n_heads, T // tq)
    kernel = functools.partial(qkv_attention_kernel, scale2=1.0 / math.sqrt(ch))

    out = pl.pallas_call(
        kernel,
        out_shape=jax.ShapeDtypeStruct((Bp, C, T), qkv.dtype),
        grid_spec=pltpu.PrefetchScalarGridSpec(
            num_scalar_prefetch=0,
            grid=grid,
            in_specs=[
                # q tile of head h: channel-block index 3*h (block width ch).
                pl.BlockSpec((bblk, ch, tq), lambda bi, h, ti: (bi, 3 * h, ti)),
                # k / v: full T; block index constant across the tq axis so the
                # tiles stay resident in VMEM while queries are tiled.
                pl.BlockSpec((bblk, ch, T), lambda bi, h, ti: (bi, 3 * h + 1, 0)),
                pl.BlockSpec((bblk, ch, T), lambda bi, h, ti: (bi, 3 * h + 2, 0)),
            ],
            out_specs=pl.BlockSpec((bblk, ch, tq), lambda bi, h, ti: (bi, h, ti)),
        ),
        compiler_params=pltpu.CompilerParams(
            dimension_semantics=("parallel", "parallel", "arbitrary"),
            vmem_limit_bytes=int(vmem_limit)),
    )(qkv, qkv, qkv)
    return out[:B] if Bp != B else out


def reference_qkv_attention_f32(qkv, n_heads):
    """Exact pure-JAX mirror of the PyTorch module (full f32 math)."""
    B, W, T = qkv.shape
    ch = W // (3 * n_heads)
    q, k, v = jnp.split(qkv.reshape(B * n_heads, 3 * ch, T), 3, axis=1)
    scale = 1.0 / math.sqrt(math.sqrt(ch))
    w = jnp.einsum('bct,bcs->bts', q * scale, k * scale)
    w = w - jnp.max(w, axis=-1, keepdims=True)
    e = jnp.exp(w)
    w = e / (1.0 + jnp.sum(e, axis=-1, keepdims=True))
    a = jnp.einsum('bts,bcs->bct', w, v)
    return a.reshape(B, n_heads * ch, T)


def reference_qkv_attention_bf16(qkv, n_heads):
    """Mirror of the kernel's math (bf16 MXU operands, f32 accumulation,
    deferred normalization) with an exact reciprocal — isolates logic bugs
    from the intended bf16 / approx-reciprocal precision trade-off."""
    B, W, T = qkv.shape
    ch = W // (3 * n_heads)
    q, k, v = jnp.split(qkv.reshape(B * n_heads, 3 * ch, T), 3, axis=1)
    scale2 = 1.0 / math.sqrt(ch)
    qs = (q.astype(jnp.float32) * scale2).astype(jnp.bfloat16)
    kb = k.astype(jnp.bfloat16)
    vb = v.astype(jnp.bfloat16)
    s = jnp.einsum('bct,bcs->bts', qs, kb, preferred_element_type=jnp.float32)
    s = s - jnp.max(s, axis=-1, keepdims=True)
    e = jnp.exp(s)
    denom = 1.0 + jnp.sum(e, axis=-1)
    a = jnp.einsum('bts,bcs->bct', e.astype(jnp.bfloat16), vb,
                   preferred_element_type=jnp.float32)
    a = a / denom[:, None, :]
    return a.reshape(B, n_heads * ch, T).astype(qkv.dtype)


if __name__ == "__main__":
    # Small shapes consistent with the module: batch=2, n_heads=2,
    # per-head channels=32 (width = 3*heads*ch = 192), seq length=128.
    B = 2
    n_heads = 2
    ch = 32
    T = 128
    W = 3 * n_heads * ch

    key = jax.random.PRNGKey(0)
    qkv = jax.random.normal(key, (B, W, T), dtype=jnp.float32)

    out = qkv_attention_legacy(qkv, n_heads)
    out = jax.block_until_ready(out)
    assert out.shape == (B, n_heads * ch, T)

    # Tight check against the bf16-precision mirror (remaining diff comes from
    # the approx reciprocal and accumulation order).
    ref_bf16 = reference_qkv_attention_bf16(qkv, n_heads)
    err_b = jnp.max(jnp.abs(out.astype(jnp.float32) - ref_bf16.astype(jnp.float32)))
    assert jnp.allclose(out.astype(jnp.float32), ref_bf16.astype(jnp.float32),
                        atol=5e-3, rtol=5e-3), f"bf16-ref max abs err = {err_b}"

    # Looser check against the exact f32 module semantics (bf16 MXU operands
    # introduce ~0.4% relative rounding on the matmul inputs).
    ref_f32 = reference_qkv_attention_f32(qkv, n_heads)
    err_f = jnp.max(jnp.abs(out - ref_f32))
    assert jnp.allclose(out, ref_f32, atol=2e-2, rtol=2e-2), (
        f"f32-ref max abs err = {err_f}")

    print("KERNEL_OK")
</pallas_src>

<mosaic_0001>
module attributes {stable_mosaic.version = 11 : i64} {
  func.func @qkv_attention_kernel(%arg0: i32, %arg1: i32, %arg2: i32, %arg3: memref<2x32x128xf32, #tpu.memory_space<vmem>>, %arg4: memref<2x32x128xf32, #tpu.memory_space<vmem>>, %arg5: memref<2x32x128xf32, #tpu.memory_space<vmem>>, %arg6: memref<2x32x128xf32, #tpu.memory_space<vmem>>) attributes {dimension_semantics = [#tpu.dimension_semantics<parallel>, #tpu.dimension_semantics<parallel>, #tpu.dimension_semantics<arbitrary>], iteration_bounds = array<i64: 1, 2, 1>, scalar_prefetch = 0 : i64, scratch_operands = 0 : i64, tpu.core_type = #tpu.core_type<tc>, window_params = [{transform_indices = @transform_0, window_bounds = array<i64: 2, 32, 128>}, {transform_indices = @transform_1, window_bounds = array<i64: 2, 32, 128>}, {transform_indices = @transform_2, window_bounds = array<i64: 2, 32, 128>}, {transform_indices = @transform_3, window_bounds = array<i64: 2, 32, 128>}]} {
    %c0 = arith.constant 0 : index
    %c0_0 = arith.constant 0 : index
    %c0_1 = arith.constant 0 : index
    %0 = vector.load %arg3[%c0, %c0_0, %c0_1] : memref<2x32x128xf32, #tpu.memory_space<vmem>>, vector<2x32x128xf32>
    %cst = arith.constant 0.176776692 : f32
    %1 = vector.broadcast %cst : f32 to vector<2x32x128xf32>
    %2 = arith.mulf %0, %1 : vector<2x32x128xf32>
    %3 = arith.truncf %2 : vector<2x32x128xf32> to vector<2x32x128xbf16>
    %c0_2 = arith.constant 0 : index
    %c0_3 = arith.constant 0 : index
    %c0_4 = arith.constant 0 : index
    %4 = vector.load %arg4[%c0_2, %c0_3, %c0_4] : memref<2x32x128xf32, #tpu.memory_space<vmem>>, vector<2x32x128xf32>
    %5 = arith.truncf %4 : vector<2x32x128xf32> to vector<2x32x128xbf16>
    %c0_5 = arith.constant 0 : index
    %c0_6 = arith.constant 0 : index
    %c0_7 = arith.constant 0 : index
    %6 = vector.load %arg5[%c0_5, %c0_6, %c0_7] : memref<2x32x128xf32, #tpu.memory_space<vmem>>, vector<2x32x128xf32>
    %7 = arith.truncf %6 : vector<2x32x128xf32> to vector<2x32x128xbf16>
    "tpu.trace_start"() <{level = 10 : i32, message = "bct,bcs->bts"}> : () -> ()
    %cst_8 = arith.constant dense<0.000000e+00> : vector<2x128x128xf32>
    %8 = tpu.matmul %3, %5, %cst_8 {dimension_numbers = #tpu.dot_dimension_numbers<[1], [1], [2], [2], [0, 0, 0, 2, 1, 2], [0], [0]>} : vector<2x32x128xbf16>, vector<2x32x128xbf16>, vector<2x128x128xf32> -> vector<2x128x128xf32>
    "tpu.trace_stop"() : () -> ()
    %cst_9 = arith.constant dense<0xFF800000> : vector<2x128xf32>
    %9 = vector.multi_reduction <maximumf>, %8, %cst_9 [2] : vector<2x128x128xf32> to vector<2x128xf32>
    %10 = vector.shape_cast %9 : vector<2x128xf32> to vector<2x128x1xf32>
    %11 = vector.broadcast %10 : vector<2x128x1xf32> to vector<2x128x128xf32>
    %12 = arith.subf %8, %11 : vector<2x128x128xf32>
    %13 = math.exp %12 : vector<2x128x128xf32>
    %cst_10 = arith.constant dense<0.000000e+00> : vector<2x128xf32>
    %14 = vector.multi_reduction <add>, %13, %cst_10 [2] : vector<2x128x128xf32> to vector<2x128xf32>
    %cst_11 = arith.constant 1.000000e+00 : f32
    %15 = vector.broadcast %cst_11 : f32 to vector<2x128xf32>
    %16 = arith.addf %15, %14 : vector<2x128xf32>
    %17 = arith.truncf %13 : vector<2x128x128xf32> to vector<2x128x128xbf16>
    "tpu.trace_start"() <{level = 10 : i32, message = "bts,bcs->bct"}> : () -> ()
    %cst_12 = arith.constant dense<0.000000e+00> : vector<2x32x128xf32>
    %18 = tpu.matmul %7, %17, %cst_12 {dimension_numbers = #tpu.dot_dimension_numbers<[2], [2], [1], [1], [0, 0, 0, 1, 1, 1], [0], [0]>} : vector<2x32x128xbf16>, vector<2x128x128xbf16>, vector<2x32x128xf32> -> vector<2x32x128xf32>
    "tpu.trace_stop"() : () -> ()
    %19 = tpu.reciprocal %16 {approx = true} : vector<2x128xf32> -> vector<2x128xf32>
    %20 = vector.shape_cast %19 : vector<2x128xf32> to vector<2x1x128xf32>
    %21 = vector.broadcast %20 : vector<2x1x128xf32> to vector<2x32x128xf32>
    %22 = arith.mulf %18, %21 : vector<2x32x128xf32>
    %c0_13 = arith.constant 0 : index
    %c0_14 = arith.constant 0 : index
    %c0_15 = arith.constant 0 : index
    %23 = vector.load %arg6[%c0_13, %c0_14, %c0_15] : memref<2x32x128xf32, #tpu.memory_space<vmem>>, vector<2x32x128xf32>
    tpu.vector_store %arg6[%c0_13, %c0_14, %c0_15], %22 {strides = array<i32>} : memref<2x32x128xf32, #tpu.memory_space<vmem>>, vector<2x32x128xf32>,
    return
  }
  func.func @transform_0(%arg0: i32, %arg1: i32, %arg2: i32) -> (i32, i32, i32) {
    %c3_i32 = arith.constant 3 : i32
    %0 = arith.muli %c3_i32, %arg1 : i32
    %c0_i32 = arith.constant 0 : i32
    return %arg0, %0, %arg2 : i32, i32, i32
  }
  func.func @transform_1(%arg0: i32, %arg1: i32, %arg2: i32) -> (i32, i32, i32) {
    %c3_i32 = arith.constant 3 : i32
    %0 = arith.muli %c3_i32, %arg1 : i32
    %c1_i32 = arith.constant 1 : i32
    %1 = arith.addi %0, %c1_i32 : i32
    %c0_i32 = arith.constant 0 : i32
    %c0_i32_0 = arith.constant 0 : i32
    return %arg0, %1, %c0_i32 : i32, i32, i32
  }
  func.func @transform_2(%arg0: i32, %arg1: i32, %arg2: i32) -> (i32, i32, i32) {
    %c3_i32 = arith.constant 3 : i32
    %0 = arith.muli %c3_i32, %arg1 : i32
    %c2_i32 = arith.constant 2 : i32
    %1 = arith.addi %0, %c2_i32 : i32
    %c0_i32 = arith.constant 0 : i32
    %c0_i32_0 = arith.constant 0 : i32
    return %arg0, %1, %c0_i32 : i32, i32, i32
  }
  func.func @transform_3(%arg0: i32, %arg1: i32, %arg2: i32) -> (i32, i32, i32) {
    %c0_i32 = arith.constant 0 : i32
    return %arg0, %arg1, %arg2 : i32, i32, i32
  }
}

</mosaic_0001>

<bundles_post_ra>
// kernel: tpu_custom_call.1
= control target key start
LH: loop header
LB: loop body
LE: loop exit
PB: predicated region body
PF: predicated region fallthrough
CT: control target
= control target key end

     0   :  { %s2812_s0 = inlined_call_operand.hbm [shape: f32[2,192,128], index: 0, kind: input, shape index: {}]   ;;  %s2813_s1 = inlined_call_operand.hbm [shape: f32[2,192,128], index: 1, kind: input, shape index: {}]   ;;  %s2814_s2 = inlined_call_operand.hbm [shape: f32[2,192,128], index: 2, kind: input, shape index: {}]   ;;  %s2815_s3 = inlined_call_operand.hbm [shape: f32[2,64,128], index: 3, kind: output, shape index: {}]  }
   0x1   :  { %2823 = sst [smem:[#allocation35_spill]] %s2812_s0 }
   0x2   :  { %2824 = sst [smem:[#allocation36_spill]] %s2815_s3 }
   0x3   :  { %8 = vsyncpa [#allocation3], 0 }
   0x4   :  { %10 = vsyncpa [#allocation3 + $0x1], 0 }
   0x5   :  { %11 = vsyncpa [#allocation6], 0 }
   0x6   :  { %13 = vsyncpa [#allocation6 + $0x1], 0 }
   0x7   :  { %14 = vsyncpa [#allocation4], 0 }
   0x8   :  { %16 = vsyncpa [#allocation4 + $0x1], 0  ;;  %s2088_s12 = smov 0   ;;  %s2090_s13 = smov 0  }
   0x9   :  { %s2092_s14 = smov 0   ;;  %s2094_s15 = smov 0  }
   0xa   :  { %s2096_s16 = smov 0   ;;  %s2098_s17 = smov 0  }
   0xb   :  { %s2100_s18 = smov 0   ;;  %s2102_s19 = smov 0  }
   0xc   :  { %s2104_s20 = smov 0   ;;  %s2106_s21 = smov 0  }
   0xd   :  { %s2108_s22 = smov 0   ;;  %s2110_s23 = smov 0  }
   0xe   :  { %s2112_s24 = smov 0   ;;  %s2114_s25 = smov 0  }
   0xf   :  { %s2116_s26 = smov 0  }
  0x10 LB: > { %2825 = sst [smem:[#allocation24_spill]] %s1985_s12  ;;  %s2162_s27 = sadd.s32 4294967295, %s2041_s26   ;;  %s2041_s26 = sphi %s2116_s26, %s22_s26   ;;  %s2037_s25 = sphi %s2114_s25, %s2859_s25   ;;  %s2033_s24 = sphi %s2112_s24, %s2858_s24   ;;  %s2029_s23 = sphi %s2110_s23, %s2857_s23   ;;  %s2025_s22 = sphi %s2108_s22, %s2869_s22   ;;  %s2021_s21 = sphi %s2106_s21, %s2868_s21   ;;  %s2017_s20 = sphi %s2104_s20, %s2867_s20   ;;  %s2013_s19 = sphi %s2102_s19, %s2866_s19   ;;  %s2009_s18 = sphi %s2100_s18, %s2865_s18   ;;  %s2005_s17 = sphi %s2098_s17, %s2864_s17   ;;  %s2001_s16 = sphi %s2096_s16, %s2863_s16   ;;  %s1997_s15 = sphi %s2094_s15, %s2862_s15   ;;  %s1993_s14 = sphi %s2092_s14, %s2853_s14   ;;  %s1989_s13 = sphi %s2090_s13, %s2861_s13   ;;  %s1985_s12 = sphi %s2088_s12, %s2860_s12  }
  0x11   : > { %2826 = sst [smem:[#allocation25_spill]] %s1993_s14  ;;  %s37_s29 = sadd.s32 1, %s2037_s25 }
  0x12   : > { %2827 = sst [smem:[#allocation26_spill]] %s2029_s23  ;;  %s45_s30 = smul.u32 3, %s2037_s25 }
  0x13   : > { %2828 = sst [smem:[#allocation27_spill]] %s2033_s24  ;;  %p39_p0 = scmp.ge.s32.totalorder %s37_s29, 2 }
  0x14   : > { %2829 = sst [smem:[#allocation28_spill]] %s2037_s25  ;;  %s54_s4 = sadd.s32 1, %s2029_s23 }
  0x15   : > { %p61_p1 = scmp.ne.s32.totalorder %s2029_s23, %s2025_s22  ;;  %p62_p2 = scmp.eq.s32.totalorder %s2041_s26, 0 }
  0x16   : > { %s2871_s29 = smov (%p39_p0, %s37_s29), 0  ;;  %p67_p4 = scmp.ne.s32.totalorder %s2025_s22, %s2021_s21 }
  0x17   : > { %2830 = sst [smem:[#allocation29_spill]] %s2871_s29  ;;  %p2175_p3 = por %p62_p2, %p61_p1 }
  0x18   : > { %s46_s6 = smul.u32 3, %s2871_s29  ;;  %p68_p5 = scmp.eq.s32.totalorder %s2162_s27, 0 }
  0x19   : > { %s78_s7 = sadd.s32 1, %s45_s30  ;;  %s86_s8 = sadd.s32 1, %s2017_s20 }
  0x1a   : > { %s48_s9 = ssub.s32 %s45_s30, %s46_s6  ;;  %p2185_p6 = por %p68_p5, %p67_p4 }
  0x1b   : > { %p52_p7 = scmp.eq.s32.totalorder %s48_s9, 0  ;;  %s80_s11 = sadd.s32 1, %s46_s6 }
  0x1c   : > { %s82_s21 = ssub.s32 %s78_s7, %s80_s11  ;;  %p93_p8 = scmp.ne.s32.totalorder %s2017_s20, %s2013_s19 }
  0x1d   : > { %s2192_s28 = scalar_select %p52_p7, %s2029_s23, %s54_s4  }
  0x1e   : > { %p84_p9 = scmp.eq.s32.totalorder %s82_s21, 0  ;;  %p2196_p10 = por %p93_p8, %p62_p2 }
  0x1f   : > { %2833 = sst [smem:[#allocation30_spill]] %s2192_s28  ;;  %p99_p11 = scmp.ne.s32.totalorder %s2013_s19, %s2009_s18 }
  0x20   : > { %s110_s9 = sadd.s32 2, %s45_s30  ;;  %s112_s7 = sadd.s32 2, %s46_s6 }
  0x21   : > { %s2203_s24 = scalar_select %p84_p9, %s2017_s20, %s86_s8  }
  0x22   : > { %p2207_p12 = por %p99_p11, %p68_p5  ;;  %s114_s11 = ssub.s32 %s110_s9, %s112_s7 }
  0x23   : > { %2835 = sst [smem:[#allocation31_spill]] %s2203_s24  ;;  %s118_s21 = sadd.s32 1, %s2005_s17 }
  0x24   : > { %s2836_s4 = scalar_select %p2207_p12, 1, 0 }
  0x25   : > { %p116_p13 = scmp.eq.s32.totalorder %s114_s11, 0  ;;  %p125_p0 = scmp.ne.s32.totalorder %s2005_s17, %s2001_s16 }
  0x26   : > { %p131_p1 = scmp.ne.s32.totalorder %s2001_s16, %s1997_s15  ;;  %s142_s18 = ssub.s32 %s2037_s25, %s2871_s29 }
  0x27   : > { %s2219_s30 = scalar_select %p116_p13, %s2005_s17, %s118_s21  }
  0x28   : > { %p2223_p4 = por %p125_p0, %p62_p2  ;;  %p2229_p7 = por %p131_p1, %p68_p5 }
  0x29   : > { %2837 = sst [smem:[#allocation32_spill]] %s2219_s30  ;;  %p146_p8 = scmp.eq.s32.totalorder %s142_s18, 0 }
  0x2a   : > { %s148_s6 = sadd.s32 1, %s1993_s14  ;;  %p158_p9 = scmp.ne.s32.totalorder %s1993_s14, %s1989_s13 }
  0x2b   : > { %p159_p11 = scmp.eq.s32.totalorder %s2162_s27, 1  ;;  %p164_p13 = scmp.ne.s32.totalorder %s1989_s13, %s1985_s12 }
  0x2c   : > { %s2238_s9 = scalar_select %p146_p8, %s1993_s14, %s148_s6  }
  0x2d   : > { %p2240_p12 = por %p159_p11, %p158_p9  ;;  %s2842_s7 = sadd.s32 4294967294, %s2041_s26  }
  0x2e   : > { %2840 = sst [smem:[#allocation33_spill]] %s2238_s9  ;;  %p165_p2 = scmp.eq.s32.totalorder %s2842_s7, 1 }
  0x2f   : > { %p1531_p5 = scmp.ge.s32.totalorder %s2041_s26, 2 }
  0x30   : > { %p2248_p0 = por %p165_p2, %p164_p13 }
  0x31   : > { %181 = sbr.rel (%p1531_p5) target bundleno = 97 (0x61), region = 16 }
  0x32   : > { %s2843_s11 = scalar_select %p2248_p0, 1, 0 }
  0x34   : > { %2844 = sst [smem:[#allocation34_spill]] %s2843_s11 }
  0x36   : > { %s185_s21 = sand.u32 1, %s2029_s23   ;;  %s2257_s18 = smul.u32 96, %s2037_s25 }
  0x37   : > { %s1532_s6 = sshll.u32 %s185_s21, 6  ;;  %s2845_s0 = sld [smem:[#allocation35_spill]] }
  0x38   : > { %s1575_s30 = scalar_select %p2175_p3, [#allocation0], [#allocation17] }
  0x39   : > { %s189_s14 = scalar_lea.vmem [#allocation2], %s1532_s6  ;;  %s2043_s25 = smov 3072  }
  0x3a   : > { %s214_s11 = sshll.u32 %s189_s14, 4  ;;  %s204_s12 = sld [smem:[%s1575_s30]]   ;;  %s215_s11 = int_to_ptr.vmem [resolvable:$true] %s214_s11 }
  0x3b   : > { %1576 = sst [smem:[#allocation10]] (%p2175_p3), %s2043_s25  ;;  %s2044_s23 = smov 512  }
  0x3c   : > { %1577 = sst [smem:[#allocation10 + $0x1]] (%p2175_p3), %s2044_s23  ;;  %s2045_s29 = smov 4  }
  0x3d   : > { %s199_s24 = scalar_lea.hbm %s2845_s0, %s2257_s18  ;;  %1578 = sst [smem:[#allocation10 + $0x2]] (%p2175_p3), %s2045_s29 }
  0x3e   : > { %s212_s9 = sshll.u32 %s199_s24, 4  ;;  %s2046_s7 = smov 128   ;;  %s213_s9 = int_to_ptr.hbm [resolvable:$true] %s212_s9 }
  0x3f   : > { %1579 = sst [smem:[#allocation10 + $0x3]] (%p2175_p3), %s2046_s7  ;;  %s2047_s30 = smov 8  }
  0x40   : > { %s1535_s24 = sshll.u32 %s204_s12, 26  ;;  %1580 = sst [smem:[#allocation10 + $0x4]] (%p2175_p3), %s2046_s7 }
  0x41   : > { %s1536_s14 = sadd.s32 134217728, %s1535_s24  ;;  %1581 = sst [smem:[#allocation10 + $0x5]] (%p2175_p3), %s2047_s30 }
  0x42   : > { %s186_s6 = scalar_lea.sflag [#allocation3], %s185_s21  ;;  %s2048_s0 = smov [#allocation9]  }
  0x43   : > { %1582 = dma.general (%p2175_p3), %s213_s9, 1024, %s215_s11, %s186_s6, %s2048_s0, [#allocation10], %s1536_s14, 0  }
  0x44   : > { %s237_s23 = sand.u32 1, %s2041_s26   ;;  %s239_s25 = sand.u32 1, %s2017_s20  }
  0x45   : > { %s1537_s12 = sshll.u32 %s239_s25, 6  ;;  %s1430_s24 = scalar_lea.hbm %s2813_s1, %s2257_s18 }
  0x46   : > { %s1431_s30 = scalar_lea.hbm %s1430_s24, 32  ;;  %s241_s21 = scalar_lea.vmem [#allocation5], %s1537_s12 }
  0x47   : > { %s266_s5 = sshll.u32 %s241_s21, 4  ;;  %s264_s9 = sshll.u32 %s1431_s30, 4  ;;  %s267_s5 = int_to_ptr.vmem [resolvable:$true] %s266_s5  ;;  %s265_s9 = int_to_ptr.hbm [resolvable:$true] %s264_s9 }
  0x48   : > { %s1583_s0 = scalar_select %p2196_p10, [#allocation0], [#allocation18] }
  0x49   : > { %s2049_s14 = smov 3072   ;;  %s2050_s6 = smov 512  }
  0x4a   : > { %s256_s11 = sld [smem:[%s1583_s0]]   ;;  %s2051_s25 = smov 4  }
  0x4b   : > { %1584 = sst [smem:[#allocation12]] (%p2196_p10), %s2049_s14  ;;  %s2052_s12 = smov 128  }
  0x4c   : > { %1585 = sst [smem:[#allocation12 + $0x1]] (%p2196_p10), %s2050_s6  ;;  %s2053_s24 = smov 8  }
  0x4d   : > { %1586 = sst [smem:[#allocation12 + $0x2]] (%p2196_p10), %s2051_s25  ;;  %s2299_s30 = scalar_lea.sflag [#allocation6], %s237_s23 }
  0x4e   : > { %1587 = sst [smem:[#allocation12 + $0x3]] (%p2196_p10), %s2052_s12  ;;  %s2054_s21 = smov [#allocation11]  }
  0x4f   : > { %1588 = sst [smem:[#allocation12 + $0x4]] (%p2196_p10), %s2052_s12 }
  0x50   : > { %s1540_s29 = sshll.u32 %s256_s11, 26  ;;  %1589 = sst [smem:[#allocation12 + $0x5]] (%p2196_p10), %s2053_s24 }
  0x51   : > { %s1541_s7 = sadd.s32 134217728, %s1540_s29 }
  0x52   : > { %1590 = dma.general (%p2196_p10), %s265_s9, 1024, %s267_s5, %s2299_s30, %s2054_s21, [#allocation12], %s1541_s7, 0  }
  0x53   : > { %s291_s0 = sand.u32 1, %s2005_s17   ;;  %s1440_s6 = scalar_lea.hbm %s2814_s2, %s2257_s18 }
  0x54   : > { %s1542_s25 = sshll.u32 %s291_s0, 6  ;;  %s1441_s12 = scalar_lea.hbm %s1440_s6, 64 }
  0x55   : > { %s316_s23 = sshll.u32 %s1441_s12, 4  ;;  %s293_s3 = scalar_lea.vmem [#allocation7], %s1542_s25  ;;  %s317_s23 = int_to_ptr.hbm [resolvable:$true] %s316_s23 }
  0x56   : > { %s1591_s29 = scalar_select %p2223_p4, [#allocation0], [#allocation19] }
  0x57   : > { %s318_s5 = sshll.u32 %s293_s3, 4  ;;  %s2055_s7 = smov 3072   ;;  %s319_s5 = int_to_ptr.vmem [resolvable:$true] %s318_s5 }
  0x58   : > { %s308_s9 = sld [smem:[%s1591_s29]]   ;;  %s2056_s24 = smov 512  }
  0x59   : > { %1592 = sst [smem:[#allocation14]] (%p2223_p4), %s2055_s7  ;;  %s2057_s18 = smov 4  }
  0x5a   : > { %1593 = sst [smem:[#allocation14 + $0x1]] (%p2223_p4), %s2056_s24  ;;  %s2058_s21 = smov 128  }
  0x5b   : > { %1594 = sst [smem:[#allocation14 + $0x2]] (%p2223_p4), %s2057_s18  ;;  %s2059_s11 = smov 8  }
  0x5c   : > { %1595 = sst [smem:[#allocation14 + $0x3]] (%p2223_p4), %s2058_s21  ;;  %s2060_s6 = smov [#allocation13]  }
  0x5d   : > { %1596 = sst [smem:[#allocation14 + $0x4]] (%p2223_p4), %s2058_s21 }
  0x5e   : > { %s1545_s0 = sshll.u32 %s308_s9, 26  ;;  %1597 = sst [smem:[#allocation14 + $0x5]] (%p2223_p4), %s2059_s11 }
  0x5f   : > { %s1546_s14 = sadd.s32 134217728, %s1545_s0 }
  0x60   : > { %1598 = dma.general (%p2223_p4), %s317_s23, 1024, %s319_s5, %s2299_s30, %s2060_s6, [#allocation14], %s1546_s14, 0  }
  0x61 PF: > { %p1547_p3 = scmp.ge.s32.totalorder %s2041_s26, 1  ;;  %p339_p10 = scmp.lt.s32.totalorder %s2041_s26, 3 }
  0x63   : > { %p340_p1 = pnand %p1547_p3, %p339_p10 }
  0x64   : > { %s345_s25 = sand.u32 (!%p340_p1), 1, %s2025_s22  }
  0x65   : > { %343 = sbr.rel (%p340_p1) target bundleno = 1017 (0x3f9), region = 32  ;;  %s1548_s12 = sshll.u32 (!%p340_p1), %s345_s25, 6 }
  0x66   : > { %s346_s29 = scalar_lea.sflag (!%p340_p1), [#allocation3], %s345_s25  ;;  %s2329_s3 = scalar_lea.vmem (!%p340_p1), [#allocation2], %s1548_s12 }
  0x6a   : > { %1968 = dma.done.wait (%p2185_p6), %s346_s29, 1024  }
  0x6b   : > { %1970 = vsyncadd (%p2185_p6), %s346_s29, 4294966272  ;;  %s355_s8 = sand.u32 1, %s2162_s27   ;;  %s357_s30 = sand.u32 1, %s2013_s19  }
  0x6c   : > { %s1549_s23 = sshll.u32 %s357_s30, 6  ;;  %s356_s5 = scalar_lea.sflag [#allocation6], %s355_s8 }
  0x6d   : > { %s2337_s9 = scalar_lea.vmem [#allocation5], %s1549_s23  ;;  %p2846_p4 = scmp.ne.s32.totalorder %s2836_s4, 0 }
  0x6f   : > { %1972 = dma.done.wait (%p2846_p4), %s356_s5, 1024  }
  0x70   : > { %1974 = vsyncadd (%p2846_p4), %s356_s5, 4294966272  ;;  %s367_s7 = sand.u32 1, %s2001_s16  }
  0x71   : > { %s1550_s24 = sshll.u32 %s367_s7, 6 }
  0x72   : > { %s2344_s10 = scalar_lea.vmem [#allocation7], %s1550_s24 }
  0x73   : > { %1976 = dma.done.wait (%p2229_p7), %s356_s5, 1024  }
  0x74   : > { %1978 = vsyncadd (%p2229_p7), %s356_s5, 4294966272  ;;  %v417_v0 = vld [vmem:[%s2329_s3] sm:$0xff]  ;;  %v418_v1 = vld [vmem:[%s2329_s3 + $0x8] sm:$0xff]  ;;  %vm513_vm0 = vcmask 261120   ;;  %s400_s27 = sand.u32 1, %s1989_s13   ;;  %vm1215_vm1 = vcmask 130112  }
  0x75   : > { %v421_v2 = vld [vmem:[%s2329_s3 + $0x20] sm:$0xff]  ;;  %v422_v3 = vld [vmem:[%s2329_s3 + $0x28] sm:$0xff]  ;;  %v425_v4 = vmul.f32 0.17677669, %v417_v0  ;;  %v426_v5 = vmul.f32 0.17677669, %v418_v1 }
  0x76   : > { %v429_v6 = vmul.f32 0.17677669, %v421_v2  ;;  %v430_v7 = vmul.f32 0.17677669, %v422_v3  ;;  %v443_v12 = vld [vmem:[%s2337_s9 + $0x10] sm:$0xff]  ;;  %v444_v15 = vld [vmem:[%s2337_s9 + $0x18] sm:$0xff] }
  0x77   : > { %v433_v8 = vpack.c.bf16 %v425_v4, %v425_v4  ;;  %v434_v9 = vpack.c.bf16 %v426_v5, %v426_v5  ;;  %v419_v18 = vld [vmem:[%s2329_s3 + $0x10] sm:$0xff]  ;;  %v441_v19 = vld [vmem:[%s2337_s9] sm:$0xff]  ;;  %v442_v20 = vld [vmem:[%s2337_s9 + $0x8] sm:$0xff]  ;;  %v451_v25 = vpack.c.bf16 %v443_v12, %v443_v12  ;;  %v452_v27 = vpack.c.bf16 %v444_v15, %v444_v15  ;;  %s1551_s28 = sshll.u32 %s400_s27, 6  ;;  %s1341_s18 = scalar_lea.sflag [#allocation4], %s400_s27 }
  0x78   : > { %v437_v10 = vpack.c.bf16 %v429_v6, %v429_v6  ;;  %v438_v11 = vpack.c.bf16 %v430_v7, %v430_v7  ;;  %v420_v22 = vld [vmem:[%s2329_s3 + $0x18] sm:$0xff]  ;;  %v423_v23 = vld [vmem:[%s2329_s3 + $0x30] sm:$0xff]  ;;  %v427_v28 = vmul.f32 0.17677669, %v419_v18  ;;  %v449_v30 = vpack.c.bf16 %v441_v19, %v441_v19  ;;  %v445_v56 = vld [vmem:[%s2337_s9 + $0x20] sm:$0xff]  ;;  %s402_s4 = scalar_lea.vmem [#allocation8], %s1551_s28 }
  0x79   : > { %v477_v13 = vunpack.c.l.b16 %v433_v8  ;;  %v478_v14 = vunpack.c.l.b16 %v434_v9  ;;  %v424_v24 = vld [vmem:[%s2329_s3 + $0x38] sm:$0xff]  ;;  %v507_v29 = vunpack.c.l.b16 %v451_v25  ;;  %v450_v31 = vpack.c.bf16 %v442_v20, %v442_v20  ;;  %v447_v50 = vld [vmem:[%s2337_s9 + $0x30] sm:$0xff]  ;;  %v446_v57 = vld [vmem:[%s2337_s9 + $0x28] sm:$0xff] }
  0x7a   : > { %v591_v16 = vunpack.c.l.b16 %v437_v10  ;;  %v592_v17 = vunpack.c.l.b16 %v438_v11  ;;  %v428_v32 = vmul.f32 0.17677669, %v420_v22  ;;  %v431_v33 = vmul.f32 0.17677669, %v423_v23  ;;  %v448_v51 = vld [vmem:[%s2337_s9 + $0x38] sm:$0xff] }
  0x7b   : > { %v481_v21 = vpack.c.b16 %v478_v14, %v477_v13  ;;  %v432_v34 = vmul.f32 0.17677669, %v424_v24  ;;  %v508_v35 = vunpack.c.l.b16 %v452_v27  ;;  %v505_v36 = vunpack.c.l.b16 %v449_v30 }
  0x7c   : > { %v595_v26 = vpack.c.b16 %v592_v17, %v591_v16  ;;  %v506_v37 = vunpack.c.l.b16 %v450_v31  ;;  %v435_v39 = vpack.c.bf16 %v427_v28, %v427_v28  ;;  %v436_v40 = vpack.c.bf16 %v428_v32, %v428_v32 }
  0x7d   : > { %v510_v38 = vpack.c.b16 %v508_v35, %v507_v29  ;;  %v439_v41 = vpack.c.bf16 %v431_v33, %v431_v33  ;;  %v440_v42 = vpack.c.bf16 %v432_v34, %v432_v34  ;;  %v455_v52 = vpack.c.bf16 %v447_v50, %v447_v50 }
  0x7e   : > { %1761 = vxpose.binary.xlu0.c.b16.start [1/4] (short) %v595_v26, %v481_v21, 128  ;;  %v509_v43 = vpack.c.b16 %v506_v37, %v505_v36  ;;  %v479_v44 = vunpack.c.l.b16 %v435_v39  ;;  %v480_v45 = vunpack.c.l.b16 %v436_v40  ;;  %v456_v53 = vpack.c.bf16 %v448_v51, %v448_v51 }
  0x7f   : > { %544 = vmatpush.bf16.msra.mxu0 %v510_v38  ;;  %v593_v46 = vunpack.c.l.b16 %v439_v41  ;;  %v594_v47 = vunpack.c.l.b16 %v440_v42  ;;  %v621_v54 = vunpack.c.l.b16 %v455_v52  ;;  %v453_v59 = vpack.c.bf16 %v445_v56, %v445_v56 }
  0x80   : > { %v482_v48 = vpack.c.b16 %v480_v45, %v479_v44  ;;  %v622_v55 = vunpack.c.l.b16 %v456_v53  ;;  %v454_v60 = vpack.c.bf16 %v446_v57, %v446_v57  ;;  %vm1219_vm2 = vcmask 195712  }
  0x81   : > { %v596_v49 = vpack.c.b16 %v594_v47, %v593_v46  ;;  %v619_v61 = vunpack.c.l.b16 %v453_v59  ;;  %vm1223_vm3 = vcmask 261312   ;;  %vm1227_vm4 = vcmask 326912  }
  0x82   : > { %v624_v58 = vpack.c.b16 %v622_v55, %v621_v54  ;;  %v620_v62 = vunpack.c.l.b16 %v454_v60  ;;  %vm1231_vm5 = vcmask 392512   ;;  %vm1235_vm6 = vcmask 458112  }
  0x83   : > { %545 = vmatpush.bf16.msra.mxu0 %v509_v43  ;;  %vm1239_vm7 = vcmask 523712   ;;  %vm1243_vm8 = vcmask 589312   ;;  %vm1247_vm9 = vcmask 654912   ;;  %vm1251_vm10 = vcmask 720512  }
  0x84   : > { %657 = vmatpush.bf16.msra.mxu1 %v624_v58  ;;  %v623_v63 = vpack.c.b16 %v620_v62, %v619_v61  ;;  %vm1255_vm11 = vcmask 786112   ;;  %vm1259_vm12 = vcmask 851712   ;;  %vm1263_vm13 = vcmask 917312  }
  0x85   : > { %vm1271_vm14 = vcmask 1048512   ;;  %vm1267_vm15 = vcmask 982912  }
  0x88   : > { %658 = vmatpush.bf16.msra.mxu1 %v623_v63 }
  0x8e   : > { %1762 = vxpose.binary.xlu0.c.b16.end [2/4] (short) %v596_v49, %v482_v48, 128 }
 0x12a   : > { %v1763_v0 = vpop.trf.xlu0 }
 0x12b   : > { %1552 = vmatmul.msk.bf16.vlgmr.msra.gmra.mxu0 %vm513_vm0, %v1763_v0 }
 0x132   : > { %v1764_v1 = vpop.trf.xlu0 }
 0x133   : > { %1560 = vmatmul.msk.bf16.vlgmr.msra.gmra.mxu1 %vm513_vm0, %v1764_v1 }
 0x13a   : > { %v1765_v2 = vpop.trf.xlu0 }
 0x13b   : > { %1553 = vmatmul.msk.bf16.gmra.mxu0 %vm513_vm0, %v1765_v2 }
 0x142   : > { %v1766_v3 = vpop.trf.xlu0 }
 0x143   : > { %1561 = vmatmul.msk.bf16.gmra.mxu1 %vm513_vm0, %v1766_v3 }
 0x14a   : > { %v1767_v4 = vpop.trf.xlu0 }
 0x14b   : > { %1554 = vmatmul.msk.bf16.gmra.mxu0 %vm513_vm0, %v1767_v4 }
 0x152   : > { %v1768_v5 = vpop.trf.xlu0 }
 0x153   : > { %1562 = vmatmul.msk.bf16.gmra.mxu1 %vm513_vm0, %v1768_v5 }
 0x15a   : > { %v1769_v6 = vpop.trf.xlu0 }
 0x15b   : > { %1555 = vmatmul.msk.bf16.gmra.mxu0 %vm513_vm0, %v1769_v6 }
 0x162   : > { %v1770_v7 = vpop.trf.xlu0 }
 0x163   : > { %1563 = vmatmul.msk.bf16.gmra.mxu1 %vm513_vm0, %v1770_v7 }
 0x16a   : > { %v1771_v8 = vpop.trf.xlu0 }
 0x16b   : > { %1556 = vmatmul.msk.bf16.gmra.mxu0 %vm513_vm0, %v1771_v8 }
 0x172   : > { %v1772_v9 = vpop.trf.xlu0 }
 0x173   : > { %1564 = vmatmul.msk.bf16.gmra.mxu1 %vm513_vm0, %v1772_v9 }
 0x17a   : > { %v1773_v10 = vpop.trf.xlu0 }
 0x17b   : > { %1557 = vmatmul.msk.bf16.gmra.mxu0 %vm513_vm0, %v1773_v10 }
 0x182   : > { %v1774_v11 = vpop.trf.xlu0 }
 0x183   : > { %1565 = vmatmul.msk.bf16.gmra.mxu1 %vm513_vm0, %v1774_v11 }
 0x18a   : > { %v1775_v12 = vpop.trf.xlu0 }
 0x18b   : > { %1558 = vmatmul.msk.bf16.gmra.mxu0 %vm513_vm0, %v1775_v12 }
 0x192   : > { %v1776_v13 = vpop.trf.xlu0 }
 0x193   : > { %1566 = vmatmul.msk.bf16.gmra.mxu1 %vm513_vm0, %v1776_v13 }
 0x19a   : > { %v1777_v14 = vpop.trf.xlu0 }
 0x19b   : > { %1559 = vmatmul.msk.bf16.gmra.mxu0 %vm513_vm0, %v1777_v14 }
 0x1a2   : > { %v1778_v15 = vpop.trf.xlu0 }
 0x1a3   : > { %1567 = vmatmul.msk.bf16.gmra.mxu1 %vm513_vm0, %v1778_v15 }
 0x1a8   : > { %v2382_v16 = vpop.f32.mrf.mxu0 }
 0x1b0   : > { %v2384_v17 = vpop.f32.mrf.mxu0  ;;  %v2386_v18 = vpop.f32.mrf.mxu1 }
 0x1b8   : > { %v2388_v19 = vpop.f32.mrf.mxu0  ;;  %v2390_v20 = vpop.f32.mrf.mxu1 }
 0x1c0   : > { %v2392_v21 = vpop.f32.mrf.mxu0  ;;  %v2394_v22 = vpop.f32.mrf.mxu1 }
 0x1c8   : > { %v2396_v23 = vpop.f32.mrf.mxu0  ;;  %v2398_v24 = vpop.f32.mrf.mxu1 }
 0x1d0   : > { %v2400_v25 = vpop.f32.mrf.mxu0  ;;  %v2402_v26 = vpop.f32.mrf.mxu1 }
 0x1d8   : > { %v2404_v27 = vpop.f32.mrf.mxu0  ;;  %v2406_v28 = vpop.f32.mrf.mxu1 }
 0x1e0   : > { %v2408_v29 = vpop.f32.mrf.mxu0  ;;  %v2410_v30 = vpop.f32.mrf.mxu1 }
 0x1e8   : > { %v2412_v31 = vpop.f32.mrf.mxu0  ;;  %v2414_v32 = vpop.f32.mrf.mxu1 }
 0x1f0   : > { %v2416_v33 = vpop.f32.mrf.mxu0  ;;  %v2418_v34 = vpop.f32.mrf.mxu1 }
 0x1f8   : > { %v2420_v35 = vpop.f32.mrf.mxu0  ;;  %v2422_v36 = vpop.f32.mrf.mxu1 }
 0x1f9   : > { %720 = vmax.xlane.f32.xlu2 %v2420_v35 }
 0x200   : > { %v2425_v37 = vpop.f32.mrf.mxu0  ;;  %v2427_v38 = vpop.f32.mrf.mxu1 }
 0x201   : > { %752 = vmax.xlane.f32.xlu2 %v2427_v38 }
 0x208   : > { %v2430_v39 = vpop.f32.mrf.mxu0  ;;  %v2432_v40 = vpop.f32.mrf.mxu1 }
 0x209   : > { %716 = vmax.xlane.f32.xlu2 %v2412_v31  ;;  %724 = vmax.xlane.f32.xlu1 %v2430_v39 }
 0x210   : > { %v690_v41 = vpop.f32.mrf.mxu1  ;;  %v2440_v43 = vpop.f32.mrf.mxu0 }
 0x211   : > { %748 = vmax.xlane.f32.xlu2 %v2418_v34  ;;  %722 = vmax.xlane.f32.xlu1 %v2425_v37 }
 0x212   : > { %756 = vmax.xlane.f32.xlu0 %v690_v41 }
 0x218   : > { %v692_v42 = vpop.f32.mrf.mxu1  ;;  %v2447_v46 = vpop.f32.mrf.mxu0 }
 0x219   : > { %712 = vmax.xlane.f32.xlu2 %v2404_v27  ;;  %754 = vmax.xlane.f32.xlu1 %v2432_v40 }
 0x220   : > { %v695_v44 = vpop.f32.mrf.mxu1  ;;  %v2451_v47 = vpop.f32.mrf.mxu0 }
 0x221   : > { %718 = vmax.xlane.f32.xlu1 %v2416_v33  ;;  %726 = vmax.xlane.f32.xlu2 %v2440_v43 }
 0x228   : > { %v697_v45 = vpop.f32.mrf.mxu1 }
 0x229   : > { %750 = vmax.xlane.f32.xlu1 %v2422_v36  ;;  %760 = vmax.xlane.f32.xlu2 %v695_v44 }
 0x231   : > { %714 = vmax.xlane.f32.xlu1 %v2408_v29  ;;  %762 = vmax.xlane.f32.xlu2 %v697_v45 }
 0x239   : > { %758 = vmax.xlane.f32.xlu1 %v692_v42  ;;  %744 = vmax.xlane.f32.xlu2 %v2410_v30 }
 0x241   : > { %728 = vmax.xlane.f32.xlu1 %v2447_v46  ;;  %708 = vmax.xlane.f32.xlu2 %v2396_v23 }
 0x249   : > { %730 = vmax.xlane.f32.xlu1 %v2451_v47  ;;  %740 = vmax.xlane.f32.xlu2 %v2402_v26 }
 0x251   : > { %746 = vmax.xlane.f32.xlu1 %v2414_v32  ;;  %704 = vmax.xlane.f32.xlu2 %v2388_v19 }
 0x259   : > { %710 = vmax.xlane.f32.xlu1 %v2400_v25  ;;  %736 = vmax.xlane.f32.xlu2 %v2394_v22 }
 0x261   : > { %742 = vmax.xlane.f32.xlu1 %v2406_v28  ;;  %700 = vmax.xlane.f32.xlu2 %v2382_v16 }
 0x269   : > { %706 = vmax.xlane.f32.xlu1 %v2392_v21  ;;  %732 = vmax.xlane.f32.xlu2 %v2386_v18 }
 0x26c   : > { %v2463_v48 = vpop.xlane.xlu2 %720 }
 0x271   : > { %738 = vmax.xlane.f32.xlu1 %v2398_v24 }
 0x274   : > { %v753_v49 = vpop.xlane.xlu2 %752 }
 0x275   : > { %v790_v10 = vsub.f32 %v2427_v38, %v753_v49 }
 0x279   : > { %702 = vmax.xlane.f32.xlu1 %v2384_v17 }
 0x27c   : > { %v2467_v50 = vpop.xlane.xlu2 %716  ;;  %v2469_v51 = vpop.xlane.xlu1 %724 }
 0x281   : > { %734 = vmax.xlane.f32.xlu1 %v2390_v20 }
 0x284   : > { %v749_v52 = vpop.xlane.xlu2 %748  ;;  %v2472_v53 = vpop.xlane.xlu1 %722 }
 0x285   : > { %v757_v62 = vpop.xlane.xlu0 %756 }
 0x286   : > { %v792_v1 = vsub.f32 %v690_v41, %v757_v62  ;;  %v848_v41 = vmul.f32 1.442695, %v790_v10 }
 0x288   : > { %v852_v5 = vmul.f32 1.442695, %v792_v1 }
 0x28c   : > { %v2474_v54 = vpop.xlane.xlu2 %712  ;;  %v755_v55 = vpop.xlane.xlu1 %754 }
 0x28d   : > { %v791_v6 = vsub.f32 %v2432_v40, %v755_v55 }
 0x28f   : > { %v850_v14 = vmul.f32 1.442695, %v791_v6 }
 0x294   : > { %v2476_v56 = vpop.xlane.xlu1 %718  ;;  %v727_v57 = vpop.xlane.xlu2 %726 }
 0x29c   : > { %v751_v58 = vpop.xlane.xlu1 %750  ;;  %v761_v59 = vpop.xlane.xlu2 %760 }
 0x29d   : > { %v794_v60 = vsub.f32 %v695_v44, %v761_v59  ;;  %v789_v55 = vsub.f32 %v2422_v36, %v751_v58 }
 0x29f   : > { %v856_v61 = vmul.f32 1.442695, %v794_v60  ;;  %v788_v60 = vsub.f32 %v2418_v34, %v749_v52  ;;  %v776_v34 = vsub.f32 %v2430_v39, %v2469_v51 }
 0x2a1   : > { %1779 = vpow2.f32 %v856_v61  ;;  %v820_v51 = vmul.f32 1.442695, %v776_v34 }
 0x2a4   : > { %v2478_v63 = vpop.xlane.xlu1 %714  ;;  %v763_v0 = vpop.xlane.xlu2 %762 }
 0x2a5   : > { %v795_v2 = vsub.f32 %v697_v45, %v763_v0  ;;  %v846_v0 = vmul.f32 1.442695, %v789_v55 }
 0x2a7   : > { %v858_v3 = vmul.f32 1.442695, %v795_v2  ;;  %v1780_v4 = vpop.eup %1779  ;;  %v844_v2 = vmul.f32 1.442695, %v788_v60 }
 0x2a8   : > { %920 = vadd.xlane.f32.xlu0 %v1780_v4  ;;  %v986_v12 = vpack.c.bf16 %v1780_v4, %v1780_v4  ;;  %v777_v4 = vsub.f32 %v2440_v43, %v727_v57 }
 0x2a9   : > { %1781 = vpow2.f32 %v858_v3 }
 0x2aa   : > { %1783 = vpow2.f32 %v852_v5  ;;  %v1109_v45 = vunpack.c.l.b16 %v986_v12  ;;  %v822_v43 = vmul.f32 1.442695, %v777_v4  ;;  %v773_v4 = vsub.f32 %v2416_v33, %v2476_v56 }
 0x2ac   : > { %v759_v7 = vpop.xlane.xlu1 %758  ;;  %v745_v8 = vpop.xlane.xlu2 %744 }
 0x2ad   : > { %v793_v9 = vsub.f32 %v692_v42, %v759_v7 }
 0x2af   : > { %v854_v11 = vmul.f32 1.442695, %v793_v9  ;;  %v2482_v13 = vpop.eup %1781  ;;  %v786_v9 = vsub.f32 %v2410_v30, %v745_v8 }
 0x2b0   : > { %v987_v15 = vpack.c.bf16 %v2482_v13, %v2482_v13  ;;  %v2486_v44 = vpop.eup %1783 }
 0x2b1   : > { %1785 = vpow2.f32 %v854_v11  ;;  %v984_v61 = vpack.c.bf16 %v2486_v44, %v2486_v44  ;;  %v840_v12 = vmul.f32 1.442695, %v786_v9 }
 0x2b2   : > { %v1110_v40 = vunpack.c.l.b16 %v987_v15  ;;  %1787 = vpow2.f32 %v850_v14 }
 0x2b3   : > { %1789 = vpow2.f32 %v848_v41  ;;  %v1107_v3 = vunpack.c.l.b16 %v984_v61 }
 0x2b4   : > { %v729_v42 = vpop.xlane.xlu1 %728  ;;  %v2489_v59 = vpop.xlane.xlu2 %708  ;;  %v1118_v49 = vpack.c.b16 %v1110_v40, %v1109_v45  ;;  %1791 = vpow2.f32 %v846_v0  ;;  %v774_v45 = vsub.f32 %v2420_v35, %v2463_v48 }
 0x2b5   : > { %v778_v38 = vsub.f32 %v2447_v46, %v729_v42 }
 0x2b6   : > { %1127 = vmatpush.bf16.xpose.msra.mxu3 %v1118_v49 }
 0x2b7   : > { %v2495_v62 = vpop.eup %1785  ;;  %v824_v36 = vmul.f32 1.442695, %v778_v38 }
 0x2b8   : > { %v985_v1 = vpack.c.bf16 %v2495_v62, %v2495_v62  ;;  %v2499_v58 = vpop.eup %1787 }
 0x2b9   : > { %v2502_v5 = vpop.eup %1789  ;;  %1793 = vpow2.f32 %v824_v36  ;;  %v983_v11 = vpack.c.bf16 %v2499_v58, %v2499_v58 }
 0x2ba   : > { %v1108_v46 = vunpack.c.l.b16 %v985_v1  ;;  %1795 = vpow2.f32 %v844_v2  ;;  %v982_v39 = vpack.c.bf16 %v2502_v5, %v2502_v5  ;;  %v2514_v15 = vpop.eup %1791 }
 0x2bb   : > { %v1106_v14 = vunpack.c.l.b16 %v983_v11  ;;  %v981_v49 = vpack.c.bf16 %v2514_v15, %v2514_v15 }
 0x2bc   : > { %v731_v52 = vpop.xlane.xlu1 %730  ;;  %v2506_v6 = vpop.xlane.xlu2 %740  ;;  %v1117_v7 = vpack.c.b16 %v1108_v46, %v1107_v3  ;;  %v1105_v8 = vunpack.c.l.b16 %v982_v39 }
 0x2bd   : > { %v779_v10 = vsub.f32 %v2451_v47, %v731_v52  ;;  %v775_v47 = vsub.f32 %v2425_v37, %v2472_v53  ;;  %v1104_v1 = vunpack.c.l.b16 %v981_v49  ;;  %v772_v52 = vsub.f32 %v2412_v31, %v2467_v50 }
 0x2be   : > { %1128 = vmatpush.bf16.xpose.msra.mxu3 %v1117_v7  ;;  %v1116_v38 = vpack.c.b16 %v1106_v14, %v1105_v8  ;;  %v814_v50 = vmul.f32 1.442695, %v773_v4 }
 0x2bf   : > { %v826_v57 = vmul.f32 1.442695, %v779_v10  ;;  %v2516_v30 = vpop.eup %1793  ;;  %v818_v60 = vmul.f32 1.442695, %v775_v47  ;;  %v812_v39 = vmul.f32 1.442695, %v772_v52 }
 0x2c0   : > { %v2520_v41 = vpop.eup %1795  ;;  %v970_v37 = vpack.c.bf16 %v2516_v30, %v2516_v30 }
 0x2c1   : > { %1797 = vpow2.f32 %v826_v57  ;;  %v980_v35 = vpack.c.bf16 %v2520_v41, %v2520_v41 }
 0x2c2   : > { %1799 = vpow2.f32 %v822_v43  ;;  %v1030_v2 = vunpack.c.l.b16 %v970_v37  ;;  %v784_v43 = vsub.f32 %v2402_v26, %v2506_v6 }
 0x2c3   : > { %1801 = vpow2.f32 %v820_v51  ;;  %v1103_v34 = vunpack.c.l.b16 %v980_v35 }
 0x2c4   : > { %v747_v40 = vpop.xlane.xlu1 %746  ;;  %v2524_v55 = vpop.xlane.xlu2 %704  ;;  %1803 = vpow2.f32 %v840_v12  ;;  %v836_v26 = vmul.f32 1.442695, %v784_v43 }
 0x2c5   : > { %v787_v42 = vsub.f32 %v2414_v32, %v747_v40  ;;  %v816_v32 = vmul.f32 1.442695, %v774_v45  ;;  %v1115_v57 = vpack.c.b16 %v1104_v1, %v1103_v34  ;;  %v771_v40 = vsub.f32 %v2408_v29, %v2478_v63 }
 0x2c6   : > { %1129 = vmatpush.bf16.xpose.msra.mxu3 %v1116_v38 }
 0x2c7   : > { %v2531_v53 = vpop.eup %1797  ;;  %v842_v61 = vmul.f32 1.442695, %v787_v42  ;;  %v810_v63 = vmul.f32 1.442695, %v771_v40 }
 0x2c8   : > { %v971_v48 = vpack.c.bf16 %v2531_v53, %v2531_v53  ;;  %v2537_v0 = vpop.eup %1799 }
 0x2c9   : > { %1805 = vpow2.f32 %v842_v61  ;;  %v2539_v36 = vpop.eup %1801  ;;  %v969_v11 = vpack.c.bf16 %v2537_v0, %v2537_v0  ;;  %v770_v61 = vsub.f32 %v2404_v27, %v2474_v54  ;;  %v768_v54 = vsub.f32 %v2396_v23, %v2489_v59 }
 0x2ca   : > { %v1031_v3 = vunpack.c.l.b16 %v971_v48  ;;  %v2541_v46 = vpop.eup %1803  ;;  %1807 = vpow2.f32 %v818_v60  ;;  %v968_v33 = vpack.c.bf16 %v2539_v36, %v2539_v36 }
 0x2cb   : > { %1809 = vpow2.f32 %v816_v32  ;;  %v978_v56 = vpack.c.bf16 %v2541_v46, %v2541_v46  ;;  %v1029_v51 = vunpack.c.l.b16 %v969_v11  ;;  %v808_v4 = vmul.f32 1.442695, %v770_v61 }
 0x2cc   : > { %v711_v7 = vpop.xlane.xlu1 %710  ;;  %v2547_v9 = vpop.xlane.xlu2 %736  ;;  %v1039_v10 = vpack.c.b16 %v1031_v3, %v1030_v2  ;;  %v1028_v6 = vunpack.c.l.b16 %v968_v33  ;;  %1811 = vpow2.f32 %v814_v50 }
 0x2cd   : > { %v1101_v47 = vunpack.c.l.b16 %v978_v56  ;;  %1813 = vpow2.f32 %v812_v39  ;;  %v804_v39 = vmul.f32 1.442695, %v768_v54 }
 0x2ce   : > { %1048 = vmatpush.bf16.xpose.msra.mxu2 %v1039_v10  ;;  %1130 = vmatpush.bf16.xpose.msra.mxu3 %v1115_v57  ;;  %v1038_v49 = vpack.c.b16 %v1029_v51, %v1028_v6  ;;  %1815 = vpow2.f32 %v836_v26  ;;  %v782_v57 = vsub.f32 %v2394_v22, %v2547_v9  ;;  %v766_v26 = vsub.f32 %v2388_v19, %v2524_v55 }
 0x2cf   : > { %v2557_v31 = vpop.eup %1805 }
 0x2d0   : > { %v979_v12 = vpack.c.bf16 %v2557_v31, %v2557_v31  ;;  %v2561_v14 = vpop.eup %1807  ;;  %v800_v61 = vmul.f32 1.442695, %v766_v26 }
 0x2d1   : > { %v2563_v45 = vpop.eup %1809  ;;  %v967_v60 = vpack.c.bf16 %v2561_v14, %v2561_v14 }
 0x2d2   : > { %v1102_v8 = vunpack.c.l.b16 %v979_v12  ;;  %v966_v29 = vpack.c.bf16 %v2563_v45, %v2563_v45  ;;  %v2575_v3 = vpop.eup %1811 }
 0x2d3   : > { %v1027_v2 = vunpack.c.l.b16 %v967_v60  ;;  %v2577_v34 = vpop.eup %1813  ;;  %v965_v43 = vpack.c.bf16 %v2575_v3, %v2575_v3 }
 0x2d4   : > { %v743_v42 = vpop.xlane.xlu1 %742  ;;  %v701_v38 = vpop.xlane.xlu2 %700  ;;  %v1114_v37 = vpack.c.b16 %v1102_v8, %v1101_v47  ;;  %v1026_v27 = vunpack.c.l.b16 %v966_v29  ;;  %v964_v56 = vpack.c.bf16 %v2577_v34, %v2577_v34 }
 0x2d5   : > { %v785_v35 = vsub.f32 %v2406_v28, %v743_v42  ;;  %v764_v48 = vsub.f32 %v2382_v16, %v701_v38  ;;  %v2579_v28 = vpop.eup %1815  ;;  %v769_v16 = vsub.f32 %v2400_v25, %v711_v7  ;;  %v1025_v51 = vunpack.c.l.b16 %v965_v43 }
 0x2d6   : > { %1049 = vmatpush.bf16.xpose.msra.mxu2 %v1038_v49  ;;  %1131 = vmatpush.bf16.xpose.msra.mxu3 %v1114_v37  ;;  %v1037_v11 = vpack.c.b16 %v1027_v2, %v1026_v27  ;;  %v976_v25 = vpack.c.bf16 %v2579_v28, %v2579_v28  ;;  %v1024_v12 = vunpack.c.l.b16 %v964_v56 }
 0x2d7   : > { %v838_v32 = vmul.f32 1.442695, %v785_v35  ;;  %v796_v1 = vmul.f32 1.442695, %v764_v48  ;;  %v806_v59 = vmul.f32 1.442695, %v769_v16 }
 0x2d8   : > { %v1099_v6 = vunpack.c.l.b16 %v976_v25  ;;  %v1036_v38 = vpack.c.b16 %v1025_v51, %v1024_v12 }
 0x2d9   : > { %1817 = vpow2.f32 %v838_v32 }
 0x2da   : > { %1819 = vpow2.f32 %v796_v1 }
 0x2db   : > { %1821 = vpow2.f32 %v810_v63 }
 0x2dc   : > { %v707_v52 = vpop.xlane.xlu1 %706  ;;  %v733_v10 = vpop.xlane.xlu2 %732  ;;  %1823 = vpow2.f32 %v808_v4 }
 0x2dd   : > { %v780_v33 = vsub.f32 %v2386_v18, %v733_v10  ;;  %v832_v18 = vmul.f32 1.442695, %v782_v57  ;;  %v767_v40 = vsub.f32 %v2392_v21, %v707_v52 }
 0x2de   : > { %1050 = vmatpush.bf16.xpose.msra.mxu2 %v1037_v11 }
 0x2df   : > { %v2593_v23 = vpop.eup %1817  ;;  %v828_v7 = vmul.f32 1.442695, %v780_v33  ;;  %v802_v55 = vmul.f32 1.442695, %v767_v40 }
 0x2e0   : > { %v2595_v50 = vpop.eup %1819  ;;  %v977_v22 = vpack.c.bf16 %v2593_v23, %v2593_v23 }
 0x2e1   : > { %v2599_v9 = vpop.eup %1821  ;;  %860 = vadd.xlane.f32.xlu2 %v2595_v50  ;;  %1825 = vpow2.f32 %v828_v7 }
 0x2e2   : > { %v1100_v47 = vunpack.c.l.b16 %v977_v22  ;;  %v2604_v8 = vpop.eup %1823  ;;  %1827 = vpow2.f32 %v806_v59  ;;  %v963_v37 = vpack.c.bf16 %v2599_v9, %v2599_v9 }
 0x2e3   : > { %1829 = vpow2.f32 %v804_v39  ;;  %v962_v19 = vpack.c.bf16 %v2604_v8, %v2604_v8 }
 0x2e4   : > { %v739_v42 = vpop.xlane.xlu1 %738  ;;  %v1113_v49 = vpack.c.b16 %v1100_v47, %v1099_v6  ;;  %1831 = vpow2.f32 %v832_v18  ;;  %v1023_v21 = vunpack.c.l.b16 %v963_v37 }
 0x2e5   : > { %v783_v60 = vsub.f32 %v2398_v24, %v739_v42  ;;  %v1022_v32 = vunpack.c.l.b16 %v962_v19 }
 0x2e6   : > { %1051 = vmatpush.bf16.xpose.msra.mxu2 %v1036_v38  ;;  %1132 = vmatpush.bf16.xpose.msra.mxu3 %v1113_v49  ;;  %v956_v38 = vpack.c.bf16 %v2595_v50, %v2595_v50  ;;  %v457_v50 = vld [vmem:[%s2344_s10] sm:$0xff] }
 0x2e7   : > { %v834_v35 = vmul.f32 1.442695, %v783_v60  ;;  %v1826_v48 = vpop.eup %1825  ;;  %v1035_v24 = vpack.c.b16 %v1023_v21, %v1022_v32  ;;  %v465_v32 = vpack.c.bf16 %v457_v50, %v457_v50 }
 0x2e8   : > { %v1828_v29 = vpop.eup %1827  ;;  %v972_v49 = vpack.c.bf16 %v1826_v48, %v1826_v48 }
 0x2e9   : > { %1833 = vpow2.f32 %v834_v35  ;;  %892 = vadd.xlane.f32.xlu2 %v1826_v48  ;;  %v1830_v63 = vpop.eup %1829  ;;  %v961_v4 = vpack.c.bf16 %v1828_v29, %v1828_v29  ;;  %v458_v48 = vld [vmem:[%s2344_s10 + $0x8] sm:$0xff] }
 0x2ea   : > { %1835 = vpow2.f32 %v800_v61  ;;  %v1832_v1 = vpop.eup %1831  ;;  %v960_v16 = vpack.c.bf16 %v1830_v63, %v1830_v63  ;;  %v1016_v61 = vunpack.c.l.b16 %v956_v38  ;;  %v1095_v19 = vunpack.c.l.b16 %v972_v49 }
 0x2eb   : > { %1837 = vpow2.f32 %v802_v55  ;;  %v974_v54 = vpack.c.bf16 %v1832_v1, %v1832_v1  ;;  %v1021_v43 = vunpack.c.l.b16 %v961_v4  ;;  %v992_v4 = vunpack.c.l.b16 %v465_v32 }
 0x2ec   : > { %v703_v2 = vpop.xlane.xlu1 %702  ;;  %v1020_v56 = vunpack.c.l.b16 %v960_v16 }
 0x2ed   : > { %v765_v27 = vsub.f32 %v2384_v17, %v703_v2  ;;  %v1097_v25 = vunpack.c.l.b16 %v974_v54  ;;  %v462_v2 = vld [vmem:[%s2344_s10 + $0x28] sm:$0xff]  ;;  %v460_v54 = vld [vmem:[%s2344_s10 + $0x18] sm:$0xff] }
 0x2ee   : > { %1052 = vmatpush.bf16.xpose.msra.mxu2 %v1035_v24  ;;  %v1034_v39 = vpack.c.b16 %v1021_v43, %v1020_v56 }
 0x2ef   : > { %v1834_v52 = vpop.eup %1833  ;;  %v798_v10 = vmul.f32 1.442695, %v765_v27 }
 0x2f0   : > { %v1836_v11 = vpop.eup %1835  ;;  %v975_v57 = vpack.c.bf16 %v1834_v52, %v1834_v52 }
 0x2f1   : > { %v1838_v33 = vpop.eup %1837  ;;  %1839 = vpow2.f32 %v798_v10  ;;  %864 = vadd.xlane.f32.xlu2 %v1836_v11  ;;  %v958_v18 = vpack.c.bf16 %v1836_v11, %v1836_v11  ;;  %v468_v10 = vpack.c.bf16 %v460_v54, %v460_v54  ;;  %v464_v11 = vld [vmem:[%s2344_s10 + $0x38] sm:$0xff] }
 0x2f2   : > { %v1098_v59 = vunpack.c.l.b16 %v975_v57  ;;  %v959_v22 = vpack.c.bf16 %v1838_v33, %v1838_v33  ;;  %v472_v57 = vpack.c.bf16 %v464_v11, %v464_v11 }
 0x2f3   : > { %v1018_v47 = vunpack.c.l.b16 %v958_v18  ;;  %v995_v56 = vunpack.c.l.b16 %v468_v10 }
 0x2f4   : > { %v735_v7 = vpop.xlane.xlu1 %734  ;;  %v1112_v51 = vpack.c.b16 %v1098_v59, %v1097_v25  ;;  %v1019_v6 = vunpack.c.l.b16 %v959_v22  ;;  %v1074_v59 = vunpack.c.l.b16 %v472_v57 }
 0x2f5   : > { %v781_v17 = vsub.f32 %v2390_v20, %v735_v7 }
 0x2f6   : > { %1053 = vmatpush.bf16.xpose.msra.mxu2 %v1034_v39  ;;  %1133 = vmatpush.bf16.xpose.msra.mxu3 %v1112_v51  ;;  %v1033_v40 = vpack.c.b16 %v1019_v6, %v1018_v47 }
 0x2f7   : > { %v1840_v12 = vpop.eup %1839  ;;  %v830_v26 = vmul.f32 1.442695, %v781_v17 }
 0x2f8   : > { %862 = vadd.xlane.f32.xlu1 %v1840_v12  ;;  %v957_v42 = vpack.c.bf16 %v1840_v12, %v1840_v12 }
 0x2f9   : > { %1841 = vpow2.f32 %v830_v26  ;;  %896 = vadd.xlane.f32.xlu2 %v1832_v1  ;;  %v466_v1 = vpack.c.bf16 %v458_v48, %v458_v48 }
 0x2fa   : > { %v1017_v20 = vunpack.c.l.b16 %v957_v42 }
 0x2fc   : > { %v1032_v35 = vpack.c.b16 %v1017_v20, %v1016_v61 }
 0x2fe   : > { %1054 = vmatpush.bf16.xpose.msra.mxu2 %v1033_v40 }
 0x2ff   : > { %v1842_v37 = vpop.eup %1841 }
 0x300   : > { %894 = vadd.xlane.f32.xlu1 %v1842_v37  ;;  %v973_v60 = vpack.c.bf16 %v1842_v37, %v1842_v37 }
 0x301   : > { %868 = vadd.xlane.f32.xlu2 %v1830_v63  ;;  %v461_v63 = vld [vmem:[%s2344_s10 + $0x20] sm:$0xff] }
 0x302   : > { %v1096_v55 = vunpack.c.l.b16 %v973_v60  ;;  %v469_v24 = vpack.c.bf16 %v461_v63, %v461_v63 }
 0x304   : > { %v1111_v21 = vpack.c.b16 %v1096_v55, %v1095_v19 }
 0x306   : > { %1055 = vmatpush.bf16.xpose.msra.mxu2 %v1032_v35  ;;  %1134 = vmatpush.bf16.xpose.msra.mxu3 %v1111_v21 }
 0x308   : > { %866 = vadd.xlane.f32.xlu1 %v1838_v33 }
 0x309   : > { %900 = vadd.xlane.f32.xlu2 %v2579_v28  ;;  %v470_v28 = vpack.c.bf16 %v462_v2, %v462_v2 }
 0x310   : > { %898 = vadd.xlane.f32.xlu1 %v1834_v52  ;;  %v463_v52 = vld [vmem:[%s2344_s10 + $0x30] sm:$0xff] }
 0x311   : > { %872 = vadd.xlane.f32.xlu2 %v2604_v8  ;;  %v993_v8 = vunpack.c.l.b16 %v466_v1  ;;  %v471_v43 = vpack.c.bf16 %v463_v52, %v463_v52 }
 0x313   : > { %v996_v27 = vpack.c.b16 %v993_v8, %v992_v4  ;;  %v1073_v25 = vunpack.c.l.b16 %v471_v43 }
 0x315   : > { %1056 = vmatmul.bf16.vlgmr.msra.gmra.mxu2 %v996_v27 }
 0x318   : > { %870 = vadd.xlane.f32.xlu1 %v1828_v29  ;;  %v1071_v29 = vunpack.c.l.b16 %v469_v24 }
 0x319   : > { %904 = vadd.xlane.f32.xlu2 %v2541_v46  ;;  %v1072_v46 = vunpack.c.l.b16 %v470_v28 }
 0x31b   : > { %v1075_v16 = vpack.c.b16 %v1072_v46, %v1071_v29 }
 0x31d   : > { %1135 = vmatmul.bf16.vlgmr.msra.gmra.mxu3 %v1075_v16 }
 0x320   : > { %902 = vadd.xlane.f32.xlu1 %v2593_v23  ;;  %v459_v23 = vld [vmem:[%s2344_s10 + $0x10] sm:$0xff] }
 0x321   : > { %876 = vadd.xlane.f32.xlu2 %v2577_v34  ;;  %v467_v34 = vpack.c.bf16 %v459_v23, %v459_v23 }
 0x323   : > { %v994_v33 = vunpack.c.l.b16 %v467_v34 }
 0x325   : > { %v997_v7 = vpack.c.b16 %v995_v56, %v994_v33 }
 0x327   : > { %1061 = vmatmul.bf16.gmra.mxu2 %v997_v7 }
 0x328   : > { %874 = vadd.xlane.f32.xlu1 %v2599_v9  ;;  %v1076_v9 = vpack.c.b16 %v1074_v59, %v1073_v25 }
 0x329   : > { %908 = vadd.xlane.f32.xlu2 %v2520_v41 }
 0x32d   : > { %1140 = vmatmul.bf16.gmra.mxu3 %v1076_v9 }
 0x330   : > { %906 = vadd.xlane.f32.xlu1 %v2557_v31 }
 0x331   : > { %880 = vadd.xlane.f32.xlu2 %v2563_v45 }
 0x338   : > { %878 = vadd.xlane.f32.xlu1 %v2575_v3 }
 0x339   : > { %882 = vadd.xlane.f32.xlu2 %v2561_v14 }
 0x340   : > { %910 = vadd.xlane.f32.xlu1 %v2514_v15 }
 0x341   : > { %884 = vadd.xlane.f32.xlu2 %v2539_v36  ;;  %v1210_v36 = vlaneseq }
 0x348   : > { %912 = vadd.xlane.f32.xlu1 %v2502_v5 }
 0x349   : > { %886 = vadd.xlane.f32.xlu2 %v2537_v0 }
 0x350   : > { %914 = vadd.xlane.f32.xlu1 %v2499_v58 }
 0x351   : > { %888 = vadd.xlane.f32.xlu2 %v2516_v30  ;;  %v2646_v30 = vand.u32 127, %v1210_v36 }
 0x353   : > { %v1217_v39 = vadd.s32 4294967280, %v2646_v30  ;;  %v1221_v48 = vadd.s32 4294967272, %v2646_v30  ;;  %v1225_v32 = vadd.s32 4294967264, %v2646_v30  ;;  %v2665_v56 = vadd.s32 4294967256, %v2646_v30 }
 0x354   : > { %v861_v41 = vpop.xlane.xlu2 %860  ;;  %v2668_v25 = vadd.s32 4294967248, %v2646_v30 }
 0x355   : > { %v924_v15 = vadd.f32 1.0, %v861_v41 }
 0x357   : > { %1843 = vrcp.f32 %v924_v15 }
 0x358   : > { %916 = vadd.xlane.f32.xlu1 %v2486_v44 }
 0x359   : > { %922 = vadd.xlane.f32.xlu2 %v2482_v13  ;;  %v1213_v13 = vadd.s32 4294967288, %v2646_v30 }
 0x35c   : > { %v893_v31 = vpop.xlane.xlu2 %892 }
 0x35d   : > { %v940_v44 = vadd.f32 1.0, %v893_v31 }
 0x360   : > { %918 = vadd.xlane.f32.xlu1 %v2495_v62  ;;  %v1844_v62 = vpop.eup %1843 }
 0x361   : > { %v1212_v12 = vperm.slane %v1844_v62, %v2646_v30 }
 0x364   : > { %v865_v14 = vpop.xlane.xlu2 %864 }
 0x365   : > { %v926_v5 = vadd.f32 1.0, %v865_v14 }
 0x367   : > { %1845 = vrcp.f32 %v926_v5 }
 0x368   : > { %890 = vadd.xlane.f32.xlu1 %v2531_v53 }
 0x36b   : > { %v863_v0 = vpop.xlane.xlu1 %862 }
 0x36c   : > { %v925_v58 = vadd.f32 1.0, %v863_v0  ;;  %v897_v45 = vpop.xlane.xlu2 %896 }
 0x36d   : > { %v942_v3 = vadd.f32 1.0, %v897_v45  ;;  %v1846_v51 = vpop.eup %1845 }
 0x36e   : > { %1847 = vrcp.f32 %v925_v58  ;;  %v1218_v6 = vperm.slane %v1846_v51, %v1217_v39 }
 0x36f   : > { %1849 = vrcp.f32 %v940_v44 }
 0x370   : > { %1851 = vrcp.f32 %v942_v3 }
 0x373   : > { %v895_v22 = vpop.xlane.xlu1 %894 }
 0x374   : > { %v1848_v53 = vpop.eup %1847  ;;  %v941_v17 = vadd.f32 1.0, %v895_v22  ;;  %v869_v18 = vpop.xlane.xlu2 %868 }
 0x375   : > { %v1214_v26 = vperm.slane %v1848_v53, %v1213_v13  ;;  %v928_v42 = vadd.f32 1.0, %v869_v18  ;;  %v1850_v38 = vpop.eup %1849  ;;  %v921_v22 = vpop.xlane.xlu0 %920 }
 0x376   : > { %1853 = vrcp.f32 %v941_v17  ;;  %v1852_v49 = vpop.eup %1851  ;;  %v1273_v19 = vperm.slane %v1850_v38, %v2646_v30  ;;  %v954_v17 = vadd.f32 1.0, %v921_v22 }
 0x377   : > { %v1216_v47 = vsel %vm1215_vm1, %v1214_v26, %v1212_v12  ;;  %1855 = vrcp.f32 %v928_v42  ;;  %v1276_v35 = vperm.slane %v1852_v49, %v1217_v39 }
 0x378   : > { %v1220_v40 = vsel %vm1219_vm2, %v1218_v6, %v1216_v47 }
 0x37b   : > { %v867_v37 = vpop.xlane.xlu1 %866 }
 0x37c   : > { %v1854_v20 = vpop.eup %1853  ;;  %v927_v60 = vadd.f32 1.0, %v867_v37  ;;  %v901_v61 = vpop.xlane.xlu2 %900 }
 0x37d   : > { %v1274_v55 = vperm.slane %v1854_v20, %v1213_v13  ;;  %v944_v63 = vadd.f32 1.0, %v901_v61  ;;  %v1856_v1 = vpop.eup %1855 }
 0x37e   : > { %1857 = vrcp.f32 %v927_v60  ;;  %v1226_v29 = vperm.slane %v1856_v1, %v1225_v32 }
 0x37f   : > { %v1275_v21 = vsel %vm1215_vm1, %v1274_v55, %v1273_v19  ;;  %1859 = vrcp.f32 %v944_v63 }
 0x380   : > { %v1277_v50 = vsel %vm1219_vm2, %v1276_v35, %v1275_v21 }
 0x383   : > { %v899_v2 = vpop.xlane.xlu1 %898 }
 0x384   : > { %v1858_v24 = vpop.eup %1857  ;;  %v943_v28 = vadd.f32 1.0, %v899_v2  ;;  %v873_v4 = vpop.xlane.xlu2 %872 }
 0x385   : > { %v1222_v8 = vperm.slane %v1858_v24, %v1221_v48  ;;  %v930_v16 = vadd.f32 1.0, %v873_v4  ;;  %v1860_v23 = vpop.eup %1859 }
 0x386   : > { %1861 = vrcp.f32 %v943_v28  ;;  %v1280_v43 = vperm.slane %v1860_v23, %v1225_v32  ;;  %v1241_v23 = vadd.s32 4294967232, %v2646_v30 }
 0x387   : > { %v1224_v46 = vsel %vm1223_vm3, %v1222_v8, %v1220_v40  ;;  %1863 = vrcp.f32 %v930_v16 }
 0x388   : > { %v1228_v27 = vsel %vm1227_vm4, %v1226_v29, %v1224_v46  ;;  %v1237_v29 = vadd.s32 4294967240, %v2646_v30 }
 0x38b   : > { %v871_v54 = vpop.xlane.xlu1 %870 }
 0x38c   : > { %v1862_v52 = vpop.eup %1861  ;;  %v929_v34 = vadd.f32 1.0, %v871_v54  ;;  %v905_v10 = vpop.xlane.xlu2 %904 }
 0x38d   : > { %v1278_v11 = vperm.slane %v1862_v52, %v1221_v48  ;;  %v1864_v59 = vpop.eup %1863  ;;  %v946_v12 = vadd.f32 1.0, %v905_v10  ;;  %v2683_v48 = vadd.s32 4294967184, %v2646_v30 }
 0x38e   : > { %1865 = vrcp.f32 %v929_v34  ;;  %v1234_v14 = vperm.slane %v1864_v59, %v2668_v25 }
 0x38f   : > { %v1279_v57 = vsel %vm1223_vm3, %v1278_v11, %v1277_v50 }
 0x390   : > { %v2662_v33 = vsel %vm1227_vm4, %v1280_v43, %v1279_v57 }
 0x393   : > { %v903_v7 = vpop.xlane.xlu1 %902 }
 0x394   : > { %v1866_v9 = vpop.eup %1865  ;;  %v877_v41 = vpop.xlane.xlu2 %876  ;;  %v945_v53 = vadd.f32 1.0, %v903_v7 }
 0x395   : > { %v1230_v31 = vperm.slane %v1866_v9, %v2665_v56  ;;  %v932_v47 = vadd.f32 1.0, %v877_v41 }
 0x396   : > { %1867 = vrcp.f32 %v945_v53 }
 0x397   : > { %v1232_v15 = vsel %vm1231_vm5, %v1230_v31, %v1228_v27  ;;  %1869 = vrcp.f32 %v954_v17  ;;  %v1245_v31 = vadd.s32 4294967224, %v2646_v30 }
 0x398   : > { %v2674_v5 = vsel %vm1235_vm6, %v1234_v14, %v1232_v15  ;;  %1871 = vrcp.f32 %v946_v12  ;;  %v2678_v20 = vpop.f32.mrf.mxu2 }
 0x399   : > { %1873 = vrcp.f32 %v932_v47 }
 0x39b   : > { %v875_v36 = vpop.xlane.xlu1 %874 }
 0x39c   : > { %v909_v0 = vpop.xlane.xlu2 %908  ;;  %v931_v42 = vadd.f32 1.0, %v875_v36  ;;  %v1868_v19 = vpop.eup %1867  ;;  %v1249_v36 = vadd.s32 4294967216, %v2646_v30 }
 0x39d   : > { %v948_v38 = vadd.f32 1.0, %v909_v0  ;;  %v2680_v35 = vpop.eup %1869  ;;  %v1282_v2 = vperm.slane %v1868_v19, %v2665_v56 }
 0x39e   : > { %v1872_v50 = vpop.eup %1871  ;;  %v1300_v16 = vperm.slane %v2680_v35, %v2683_v48 }
 0x39f   : > { %v2687_v1 = vpop.eup %1873  ;;  %v1283_v52 = vsel %vm1231_vm5, %v1282_v2, %v2662_v33  ;;  %v1284_v57 = vperm.slane %v1872_v50, %v2668_v25 }
 0x3a0   : > { %v2676_v6 = vpop.f32.mrf.mxu3  ;;  %v2697_v59 = vpop.f32.mrf.mxu2 }
 0x3a1   : > { %v1285_v33 = vsel %vm1235_vm6, %v1284_v57, %v1283_v52 }
 0x3a3   : > { %v907_v58 = vpop.xlane.xlu1 %906 }
 0x3a4   : > { %v881_v45 = vpop.xlane.xlu2 %880  ;;  %v947_v40 = vadd.f32 1.0, %v907_v58  ;;  %v1253_v58 = vadd.s32 4294967208, %v2646_v30 }
 0x3a5   : > { %v934_v24 = vadd.f32 1.0, %v881_v45 }
 0x3a6   : > { %1875 = vrcp.f32 %v947_v40 }
 0x3a7   : > { %1877 = vrcp.f32 %v931_v42  ;;  %v1261_v42 = vadd.s32 4294967192, %v2646_v30 }
 0x3a8   : > { %1879 = vrcp.f32 %v948_v38  ;;  %v2685_v32 = vpop.f32.mrf.mxu3  ;;  %v1269_v38 = vadd.s32 4294967176, %v2646_v30 }
 0x3aa   : > { %v1062_v2 = vpop.f32.mrf.mxu2 }
 0x3ab   : > { %v879_v44 = vpop.xlane.xlu1 %878 }
 0x3ac   : > { %v883_v13 = vpop.xlane.xlu2 %882  ;;  %v933_v49 = vadd.f32 1.0, %v879_v44  ;;  %v1876_v28 = vpop.eup %1875 }
 0x3ad   : > { %v935_v4 = vadd.f32 1.0, %v883_v13  ;;  %v1878_v8 = vpop.eup %1877  ;;  %v1286_v34 = vperm.slane %v1876_v28, %v1237_v29  ;;  %v1257_v13 = vadd.s32 4294967200, %v2646_v30 }
 0x3ae   : > { %1881 = vrcp.f32 %v933_v49  ;;  %v1880_v27 = vpop.eup %1879  ;;  %v1238_v41 = vperm.slane %v1878_v8, %v1237_v29 }
 0x3af   : > { %v1287_v25 = vsel %vm1239_vm7, %v1286_v34, %v1285_v33  ;;  %v1288_v44 = vperm.slane %v1880_v27, %v1241_v23 }
 0x3b1   : > { %v1289_v12 = vsel %vm1243_vm8, %v1288_v44, %v1287_v25 }
 0x3b3   : > { %v911_v3 = vpop.xlane.xlu1 %910 }
 0x3b4   : > { %v885_v62 = vpop.xlane.xlu2 %884  ;;  %v949_v37 = vadd.f32 1.0, %v911_v3  ;;  %v1882_v54 = vpop.eup %1881 }
 0x3b5   : > { %v936_v10 = vadd.f32 1.0, %v885_v62  ;;  %v1141_v62 = vpop.f32.mrf.mxu3  ;;  %v1246_v22 = vperm.slane %v1882_v54, %v1245_v31 }
 0x3b6   : > { %1883 = vrcp.f32 %v949_v37 }
 0x3bb   : > { %v913_v39 = vpop.xlane.xlu1 %912 }
 0x3bc   : > { %v887_v51 = vpop.xlane.xlu2 %886  ;;  %v950_v60 = vadd.f32 1.0, %v913_v39  ;;  %v1884_v43 = vpop.eup %1883 }
 0x3bd   : > { %v937_v56 = vadd.f32 1.0, %v887_v51  ;;  %v1290_v45 = vperm.slane %v1884_v43, %v1245_v31  ;;  %v1240_v51 = vsel %vm1239_vm7, %v1238_v41, %v2674_v5  ;;  %v1143_v43 = vpop.f32.mrf.mxu3 }
 0x3be   : > { %1885 = vrcp.f32 %v950_v60 }
 0x3bf   : > { %v1291_v40 = vsel %vm1247_vm9, %v1290_v45, %v1289_v12 }
 0x3c3   : > { %v915_v18 = vpop.xlane.xlu1 %914 }
 0x3c4   : > { %v889_v26 = vpop.xlane.xlu2 %888  ;;  %v951_v55 = vadd.f32 1.0, %v915_v18  ;;  %v1886_v9 = vpop.eup %1885  ;;  %v1242_v18 = vperm.slane %v2687_v1, %v1241_v23 }
 0x3c5   : > { %v938_v14 = vadd.f32 1.0, %v889_v26  ;;  %v1292_v3 = vperm.slane %v1886_v9, %v1249_v36 }
 0x3c6   : > { %1887 = vrcp.f32 %v951_v55  ;;  %v1244_v37 = vsel %vm1243_vm8, %v1242_v18, %v1240_v51 }
 0x3c7   : > { %v1293_v60 = vsel %vm1251_vm10, %v1292_v3, %v1291_v40  ;;  %v1248_v55 = vsel %vm1247_vm9, %v1246_v22, %v1244_v37 }
 0x3cb   : > { %v917_v61 = vpop.xlane.xlu1 %916 }
 0x3cc   : > { %v952_v21 = vadd.f32 1.0, %v917_v61  ;;  %v923_v63 = vpop.xlane.xlu2 %922  ;;  %v1888_v15 = vpop.eup %1887 }
 0x3cd   : > { %v955_v46 = vadd.f32 1.0, %v923_v63  ;;  %v1294_v53 = vperm.slane %v1888_v15, %v1253_v58 }
 0x3ce   : > { %1889 = vrcp.f32 %v952_v21 }
 0x3cf   : > { %1891 = vrcp.f32 %v934_v24  ;;  %v1295_v21 = vsel %vm1255_vm11, %v1294_v53, %v1293_v60 }
 0x3d0   : > { %1893 = vrcp.f32 %v935_v4 }
 0x3d1   : > { %1895 = vrcp.f32 %v955_v46 }
 0x3d3   : > { %v919_v11 = vpop.xlane.xlu1 %918 }
 0x3d4   : > { %v953_v7 = vadd.f32 1.0, %v919_v11  ;;  %v1890_v0 = vpop.eup %1889 }
 0x3d5   : > { %v1892_v39 = vpop.eup %1891  ;;  %v1296_v26 = vperm.slane %v1890_v0, %v1257_v13 }
 0x3d6   : > { %1897 = vrcp.f32 %v953_v7  ;;  %v1894_v17 = vpop.eup %1893  ;;  %v1250_v1 = vperm.slane %v1892_v39, %v1249_v36 }
 0x3d7   : > { %1899 = vrcp.f32 %v936_v10  ;;  %v1896_v47 = vpop.eup %1895  ;;  %v1297_v30 = vsel %vm1259_vm12, %v1296_v26, %v1295_v21  ;;  %v1254_v27 = vperm.slane %v1894_v17, %v1253_v58 }
 0x3d8   : > { %1901 = vrcp.f32 %v937_v56  ;;  %v1302_v28 = vperm.slane %v1896_v47, %v1269_v38  ;;  %v1252_v8 = vsel %vm1251_vm10, %v1250_v1, %v1248_v55 }
 0x3d9   : > { %1903 = vrcp.f32 %v938_v14  ;;  %v1256_v57 = vsel %vm1255_vm11, %v1254_v27, %v1252_v8 }
 0x3db   : > { %v891_v5 = vpop.xlane.xlu1 %890 }
 0x3dc   : > { %v1898_v49 = vpop.eup %1897  ;;  %v939_v61 = vadd.f32 1.0, %v891_v5 }
 0x3dd   : > { %v1900_v19 = vpop.eup %1899  ;;  %v1298_v50 = vperm.slane %v1898_v49, %v1261_v42 }
 0x3de   : > { %v1902_v63 = vpop.eup %1901  ;;  %1905 = vrcp.f32 %v939_v61  ;;  %v1258_v29 = vperm.slane %v1900_v19, %v1257_v13 }
 0x3df   : > { %v1904_v24 = vpop.eup %1903  ;;  %v1299_v4 = vsel %vm1263_vm13, %v1298_v50, %v1297_v30  ;;  %v1262_v23 = vperm.slane %v1902_v63, %v1261_v42 }
 0x3e0   : > { %v1301_v46 = vsel %vm1267_vm15, %v1300_v16, %v1299_v4  ;;  %v1266_v52 = vperm.slane %v1904_v24, %v2683_v48  ;;  %v1260_v35 = vsel %vm1259_vm12, %v1258_v29, %v1256_v57 }
 0x3e1   : > { %v1303_v54 = vsel %vm1271_vm14, %v1302_v28, %v1301_v46  ;;  %v1264_v9 = vsel %vm1263_vm13, %v1262_v23, %v1260_v35 }
 0x3e2   : > { %v1328_v34 = vmul.f32 %v1303_v54, %v2676_v6  ;;  %v1329_v10 = vmul.f32 %v1303_v54, %v2685_v32  ;;  %v1330_v11 = vmul.f32 %v1303_v54, %v1141_v62  ;;  %v1331_v56 = vmul.f32 %v1303_v54, %v1143_v43  ;;  %v1064_v32 = vpop.f32.mrf.mxu2 }
 0x3e3   : > { %v1268_v6 = vsel %vm1267_vm15, %v1266_v52, %v1264_v9 }
 0x3e4   : > { %v1906_v7 = vpop.eup %1905  ;;  %1336 = vst [vmem:[%s402_s4 + $0x20] sm:$0xff] %v1328_v34 }
 0x3e5   : > { %1337 = vst [vmem:[%s402_s4 + $0x28] sm:$0xff] %v1329_v10  ;;  %v1270_v16 = vperm.slane %v1906_v7, %v1269_v38 }
 0x3e6   : > { %1338 = vst [vmem:[%s402_s4 + $0x30] sm:$0xff] %v1330_v11 }
 0x3e7   : > { %v1272_v48 = vsel %vm1271_vm14, %v1270_v16, %v1268_v6  ;;  %1339 = vst [vmem:[%s402_s4 + $0x38] sm:$0xff] %v1331_v56 }
 0x3e8   : > { %v1324_v41 = vmul.f32 %v1272_v48, %v2678_v20  ;;  %v1325_v31 = vmul.f32 %v1272_v48, %v2697_v59  ;;  %v1326_v14 = vmul.f32 %v1272_v48, %v1062_v2  ;;  %v1327_v15 = vmul.f32 %v1272_v48, %v1064_v32 }
 0x3ea   : > { %1332 = vst [vmem:[%s402_s4] sm:$0xff] %v1324_v41 }
 0x3eb   : > { %1333 = vst [vmem:[%s402_s4 + $0x8] sm:$0xff] %v1325_v31 }
 0x3ec   : > { %1334 = vst [vmem:[%s402_s4 + $0x10] sm:$0xff] %v1326_v14 }
 0x3ed   : > { %1335 = vst [vmem:[%s402_s4 + $0x18] sm:$0xff] %v1327_v15 }
 0x3ee   : > { %s2847_s21 = sld [smem:[#allocation27_spill]]  ;;  %s1367_s14 = sshll.u32 %s402_s4, 4  ;;  %s1368_s14 = int_to_ptr.vmem [resolvable:$true] %s1367_s14 }
 0x3ef   : > { %s2848_s25 = sld [smem:[#allocation36_spill]]  ;;  %s2061_s3 = smov 512  }
 0x3f0   : > { %1602 = sst [smem:[#allocation16]] (%p2240_p12), %s2061_s3  ;;  %s2062_s8 = smov 1024  }
 0x3f1   : > { %1603 = sst [smem:[#allocation16 + $0x1]] (%p2240_p12), %s2062_s8  ;;  %s2063_s30 = smov 4  }
 0x3f2   : > { %1604 = sst [smem:[#allocation16 + $0x2]] (%p2240_p12), %s2063_s30  ;;  %s2064_s23 = smov 128  }
 0x3f3   : > { %1605 = sst [smem:[#allocation16 + $0x3]] (%p2240_p12), %s2064_s23  ;;  %s2065_s5 = smov 8  }
 0x3f4   : > { %s1574_s0 = sshll.u32 %s2847_s21, 5  ;;  %1606 = sst [smem:[#allocation16 + $0x4]] (%p2240_p12), %s2064_s23 }
 0x3f5   : > { %s1356_s12 = scalar_lea.hbm %s2848_s25, %s1574_s0  ;;  %1607 = sst [smem:[#allocation16 + $0x5]] (%p2240_p12), %s2065_s5 }
 0x3f6   : > { %s1369_s29 = sshll.u32 %s1356_s12, 4  ;;  %s2066_s9 = smov [#allocation15]   ;;  %s1370_s29 = int_to_ptr.hbm [resolvable:$true] %s1369_s29 }
 0x3f7   : > { %s2067_s7 = smov 0  }
 0x3f8   : > { %1608 = dma.general (%p2240_p12), %s1368_s14, 1024, %s1370_s29, %s1341_s18, %s2066_s9, [#allocation16], %s2067_s7, 0  }
 0x3f9 PF: > { %s2849_s24 = sld [smem:[#allocation24_spill]]  ;;  %p1611_p6 = pnand %p1531_p5, %p2248_p0 }
 0x3fb   : > { %p1612_p7 = pneg %p1611_p6 }
 0x3ff   : > { %s1397_s27 = sand.u32 1, %s2849_s24  }
 0x400   : > { %s1398_s28 = scalar_lea.sflag [#allocation4], %s1397_s27 }
 0x401   : > { %1980 = dma.done.wait (%p1612_p7), %s1398_s28, 1024  }
 0x402   : > { %1982 = vsyncadd (%p1612_p7), %s1398_s28, 4294966272  ;;  %s22_s26 = sadd.s32 1, %s2041_s26   ;;  %s2852_s15 = sld [smem:[#allocation25_spill]] }
 0x403   : > { %p2762_p8 = scmp.ge.s32.totalorder %s22_s26, 4   ;;  %s2853_s14 = sld [smem:[#allocation33_spill]] }
 0x404   : > { %s2854_s18 = sld [smem:[#allocation32_spill]]  ;;  %s2860_s12 = smov %s1989_s13 }
 0x405   : > { %s2855_s21 = sld [smem:[#allocation31_spill]] }
 0x406   : > { %s2856_s0 = sld [smem:[#allocation26_spill]] }
 0x407   : > { %s2857_s23 = sld [smem:[#allocation30_spill]] }
 0x408   : > { %s2858_s24 = sld [smem:[#allocation28_spill]]  ;;  %s2861_s13 = smov %s2852_s15 }
 0x409   : > { %s2859_s25 = sld [smem:[#allocation29_spill]]  ;;  %s2862_s15 = smov %s2001_s16 }
 0x40a   : > { %s2863_s16 = smov %s2005_s17  ;;  %s2864_s17 = smov %s2854_s18 }
 0x40b   : > { %s2865_s18 = smov %s2013_s19  ;;  %s2866_s19 = smov %s2017_s20 }
 0x40c   : > { %s2867_s20 = smov %s2855_s21  ;;  %s2868_s21 = smov %s2025_s22 }
 0x40d   : > { %s2869_s22 = smov %s2856_s0  ;;  %21 = sbr.rel (!%p2762_p8) target bundleno = 16 (0x10), region = 121 }
 0x412   :  { %1404 = vsyncpa [#allocation3], 1 }
 0x413   :  { %1406 = vsyncpa [#allocation3 + $0x1], 1 }
 0x414   :  { %1407 = vsyncpa [#allocation6], 1 }
 0x415   :  { %1409 = vsyncpa [#allocation6 + $0x1], 1 }
 0x416   :  { %1410 = vsyncpa [#allocation4], 1 }
 0x417   :  { %1412 = vsyncpa [#allocation4 + $0x1], 1 }

</bundles_post_ra>
